<compile_context>
chip_gen: v7x
topology: tpu7x:2x2x1
jax: 0.10.0
libtpu: 0.0.40
codegen_flags: <defaults>
</compile_context>

<pallas_src>
import jax
import jax.numpy as jnp
import numpy as np
from jax import lax
from jax.experimental import pallas as pl
from jax.experimental.pallas import tpu as pltpu


# --------------------------------------------------------------------------
# In-kernel helpers (pixels-on-lanes formulation)
# --------------------------------------------------------------------------
def _stencil_masks(H, W, HW):
    """Validity masks (1, HW) for the 9 taps of a 3x3 'same' conv (None = all valid)."""
    hw = lax.broadcasted_iota(jnp.int32, (1, HW), 1)
    col = hw % W
    row_ok = {-1: hw >= W, 0: None, 1: hw < (H - 1) * W}
    col_ok = {-1: col >= 1, 0: None, 1: col <= W - 2}
    masks = []
    for dy in (-1, 0, 1):
        for dx in (-1, 0, 1):
            r, c = row_ok[dy], col_ok[dx]
            if r is None:
                masks.append(c)
            elif c is None:
                masks.append(r)
            else:
                masks.append(r & c)
    return masks


def _conv3x3_bn_relu(x, w_ref, b_ref, masks, W):
    """x: (Cin, HW) pixels-on-lanes.  w_ref: (9, Cout, Cin) with BN scale folded.
    b_ref: (Cout, 1) folded BN bias.  Returns (Cout, HW) f32 after ReLU."""
    HW = x.shape[-1]
    acc = None
    t = 0
    for dy in (-1, 0, 1):
        for dx in (-1, 0, 1):
            s = dy * W + dx                       # tap reads x[:, hw + s]
            if s == 0:
                xs = x
            else:
                xs = pltpu.roll(x, shift=(-s) % HW, axis=1)   # xs[:, hw] = x[:, hw + s]
            m = masks[t]
            if m is not None:
                xs = jnp.where(m, xs, 0.0)        # zero "same" padding
            part = jnp.dot(w_ref[t], xs, preferred_element_type=jnp.float32)
            acc = part if acc is None else acc + part
            t += 1
    return jnp.maximum(acc + b_ref[...], 0.0)


def _make_kernel(H, W):
    HW = H * W

    def kernel(feat_ref, coord_ref, w1_ref, b1_ref, w2_ref, b2_ref, o_ref):
        # feat_ref : (1, Cm, HW)   coord_ref: (1, 2, HW)   -- channels on sublanes
        # w1_ref   : (9, C1, C0)   b1_ref: (C1, 1)
        # w2_ref   : (9, C2, C1)   b2_ref: (C2, 1)
        # o_ref    : (1, C2, HW)   lane-dense output block
        x0 = jnp.concatenate([feat_ref[0], coord_ref[0]], axis=0)   # (C0, HW), aligned sublane concat
        masks = _stencil_masks(H, W, HW)
        y1 = _conv3x3_bn_relu(x0, w1_ref, b1_ref, masks, W)         # (C1, HW), stays in vregs/VMEM
        y2 = _conv3x3_bn_relu(y1, w2_ref, b2_ref, masks, W)         # (C2, HW)
        o_ref[0] = y2.astype(o_ref.dtype)

    return kernel


# --------------------------------------------------------------------------
# Parameter folding (call ONCE at parameter-load time, not per forward)
# --------------------------------------------------------------------------
def fold_params(params):
    """params: [(w HWIO (3,3,Cin,Cout), bn_scale (Cout,), bn_bias (Cout,))] x 2.
    Folds inference BN into the conv weights and re-lays weights as (9, Cout, Cin)."""
    folded = []
    for (w, scale, bias) in params:
        cin, cout = w.shape[2], w.shape[3]
        ws = (w * scale[None, None, None, :]).astype(jnp.float32)          # HWIO
        wt = jnp.transpose(ws, (0, 1, 3, 2)).reshape(9, cout, cin)         # (ky*3+kx, Cout, Cin)
        bt = bias.reshape(cout, 1).astype(jnp.float32)
        folded.append((wt, bt))
    return folded
    # TODO(synk): training-mode BatchNorm (batch statistics) is not implemented;
    # BN is folded in inference form only.


# --------------------------------------------------------------------------
# FeatureAdjuster forward (wrapper: free reshapes + one pallas_call)
# --------------------------------------------------------------------------
@jax.jit
def feature_adjuster(feat_c, coord_norm, w1k, b1k, w2k, b2k):
    """feat_c: (N, c_model, H, W), coord_norm: (N, 2, H, W) -- NCHW like PyTorch.
    w*/b*: pre-folded parameters from fold_params(). Returns (N, c_model, H, W)."""
    N, Cm, H, W = feat_c.shape
    Cc = coord_norm.shape[1]
    HW = H * W
    C0 = Cm + Cc                 # 34
    C1 = w1k.shape[1]            # 48
    C2 = w2k.shape[1]            # 32

    # NCHW -> (N, C, H*W): free reshapes, no transposes.
    feat = feat_c.reshape(N, Cm, HW).astype(jnp.float32)
    coord = coord_norm.reshape(N, Cc, HW).astype(jnp.float32)

    out = pl.pallas_call(
        _make_kernel(H, W),
        out_shape=jax.ShapeDtypeStruct((N, C2, HW), jnp.float32),
        grid=(N,),
        in_specs=[
            pl.BlockSpec((1, Cm, HW), lambda n: (n, 0, 0)),
            pl.BlockSpec((1, Cc, HW), lambda n: (n, 0, 0)),
            pl.BlockSpec((9, C1, C0), lambda n: (0, 0, 0)),
            pl.BlockSpec((C1, 1), lambda n: (0, 0)),
            pl.BlockSpec((9, C2, C1), lambda n: (0, 0, 0)),
            pl.BlockSpec((C2, 1), lambda n: (0, 0)),
        ],
        out_specs=pl.BlockSpec((1, C2, HW), lambda n: (n, 0, 0)),
        compiler_params=pltpu.CompilerParams(
            dimension_semantics=("parallel",)),   # 2 images -> 2 TCs on v7x
    )(feat, coord, w1k, b1k, w2k, b2k)

    # Already channel-major: free reshape back to NCHW.
    return out.reshape(N, C2, H, W)


# --------------------------------------------------------------------------
# Pure-JAX reference (for correctness check)
# --------------------------------------------------------------------------
def feature_adjuster_ref(feat_c, coord_norm, params):
    x = jnp.concatenate([feat_c, coord_norm], axis=1)  # NCHW
    for (w, scale, bias) in params:
        xn = jnp.transpose(x, (0, 2, 3, 1))
        y = lax.conv_general_dilated(
            xn, w, window_strides=(1, 1), padding="SAME",
            dimension_numbers=("NHWC", "HWIO", "NHWC"),
            precision=lax.Precision.HIGHEST)
        y = y * scale[None, None, None, :] + bias[None, None, None, :]
        y = jnp.maximum(y, 0.0)
        x = jnp.transpose(y, (0, 3, 1, 2))
    return x


if __name__ == "__main__":
    key = jax.random.PRNGKey(0)

    # Small config consistent with the module: c_model, coarse_dims=[...]
    N, H, W = 2, 16, 16
    c_model, coarse_dims = 32, [48]
    channels = [c_model + 2] + coarse_dims + [c_model]   # [34, 48, 32]

    keys = jax.random.split(key, 2 + 5 * (len(channels) - 1))
    feat_c = jax.random.normal(keys[0], (N, c_model, H, W), jnp.float32)
    coord_norm = jax.random.normal(keys[1], (N, 2, H, W), jnp.float32)

    # Deterministic synthetic parameters for each conv_bn block (inference BN).
    params = []
    ki = 2
    eps = 1e-5
    for d_in, d_out in zip(channels[:-1], channels[1:]):
        w = jax.random.normal(keys[ki], (3, 3, d_in, d_out), jnp.float32) * 0.05
        gamma = 1.0 + 0.1 * jax.random.normal(keys[ki + 1], (d_out,), jnp.float32)
        beta = 0.1 * jax.random.normal(keys[ki + 2], (d_out,), jnp.float32)
        run_mean = 0.1 * jax.random.normal(keys[ki + 3], (d_out,), jnp.float32)
        run_var = jnp.abs(jax.random.normal(keys[ki + 4], (d_out,), jnp.float32)) + 0.5
        scale = gamma / jnp.sqrt(run_var + eps)
        bias = beta - run_mean * scale
        params.append((w, scale, bias))
        ki += 5

    # Fold BN / re-layout weights ONCE (parameter-load time).
    (w1k, b1k), (w2k, b2k) = fold_params(params)

    out = jax.block_until_ready(
        feature_adjuster(feat_c, coord_norm, w1k, b1k, w2k, b2k))
    ref = jax.block_until_ready(feature_adjuster_ref(feat_c, coord_norm, params))

    assert out.shape == (N, c_model, H, W), out.shape
    np.testing.assert_allclose(np.asarray(out), np.asarray(ref), rtol=2e-3, atol=2e-3)
    print("KERNEL_OK")
</pallas_src>

<mosaic_0001>
module attributes {stable_mosaic.version = 11 : i64} {
  func.func @kernel(%arg0: i32, %arg1: memref<1x32x256xf32, #tpu.memory_space<vmem>>, %arg2: memref<1x2x256xf32, #tpu.memory_space<vmem>>, %arg3: memref<9x48x34xf32, #tpu.memory_space<vmem>>, %arg4: memref<48x1xf32, #tpu.memory_space<vmem>>, %arg5: memref<9x32x48xf32, #tpu.memory_space<vmem>>, %arg6: memref<32x1xf32, #tpu.memory_space<vmem>>, %arg7: memref<1x32x256xf32, #tpu.memory_space<vmem>>) attributes {dimension_semantics = [#tpu.dimension_semantics<parallel>], iteration_bounds = array<i64: 2>, scalar_prefetch = 0 : i64, scratch_operands = 0 : i64, tpu.core_type = #tpu.core_type<tc>, window_params = [{transform_indices = @transform_0, window_bounds = array<i64: 1, 32, 256>}, {transform_indices = @transform_1, window_bounds = array<i64: 1, 2, 256>}, {pipeline_mode = #tpu.pipeline_mode<synchronous>, transform_indices = @transform_2, window_bounds = array<i64: 9, 48, 34>}, {pipeline_mode = #tpu.pipeline_mode<synchronous>, transform_indices = @transform_3, window_bounds = array<i64: 48, 1>}, {pipeline_mode = #tpu.pipeline_mode<synchronous>, transform_indices = @transform_4, window_bounds = array<i64: 9, 32, 48>}, {pipeline_mode = #tpu.pipeline_mode<synchronous>, transform_indices = @transform_5, window_bounds = array<i64: 32, 1>}, {transform_indices = @transform_6, window_bounds = array<i64: 1, 32, 256>}]} {
    %c0 = arith.constant 0 : index
    %c0_0 = arith.constant 0 : index
    %c0_1 = arith.constant 0 : index
    %0 = vector.load %arg1[%c0, %c0_0, %c0_1] : memref<1x32x256xf32, #tpu.memory_space<vmem>>, vector<1x32x256xf32>
    %1 = vector.shape_cast %0 : vector<1x32x256xf32> to vector<32x256xf32>
    %c0_2 = arith.constant 0 : index
    %c0_3 = arith.constant 0 : index
    %c0_4 = arith.constant 0 : index
    %2 = vector.load %arg2[%c0_2, %c0_3, %c0_4] : memref<1x2x256xf32, #tpu.memory_space<vmem>>, vector<1x2x256xf32>
    %3 = vector.shape_cast %2 : vector<1x2x256xf32> to vector<2x256xf32>
    %4 = tpu.concatenate %1, %3 in 0 : vector<32x256xf32>, vector<2x256xf32> -> vector<34x256xf32>
    %5 = tpu.iota {dimensions = array<i32: 1>} : vector<1x256xi32>
    %c16_i32 = arith.constant 16 : i32
    %c0_i32 = arith.constant 0 : i32
    %6 = arith.cmpi eq, %c16_i32, %c0_i32 : i32
    %c1_i32 = arith.constant 1 : i32
    %7 = arith.select %6, %c1_i32, %c16_i32 : i32
    %8 = vector.broadcast %7 : i32 to vector<1x256xi32>
    %9 = arith.remsi %5, %8 : vector<1x256xi32>
    %c0_i32_5 = arith.constant 0 : i32
    %10 = vector.broadcast %c0_i32_5 : i32 to vector<1x256xi32>
    %11 = arith.cmpi ne, %9, %10 : vector<1x256xi32>
    %c0_i32_6 = arith.constant 0 : i32
    %12 = vector.broadcast %c0_i32_6 : i32 to vector<1x256xi32>
    %13 = arith.cmpi slt, %9, %12 : vector<1x256xi32>
    %c0_i32_7 = arith.constant 0 : i32
    %14 = arith.cmpi slt, %7, %c0_i32_7 : i32
    %15 = vector.broadcast %14 : i1 to vector<1x256xi1>
    %16 = vector.broadcast %15 : vector<1x256xi1> to vector<1x256xi1>
    %17 = arith.xori %13, %16 : vector<1x256xi1>
    %18 = arith.andi %17, %11 : vector<1x256xi1>
    %19 = vector.broadcast %7 : i32 to vector<1x256xi32>
    %20 = arith.addi %9, %19 : vector<1x256xi32>
    %21 = arith.select %18, %20, %9 : vector<1x256xi1>, vector<1x256xi32>
    %c16_i32_8 = arith.constant 16 : i32
    %22 = vector.broadcast %c16_i32_8 : i32 to vector<1x256xi32>
    %23 = arith.cmpi sge, %5, %22 : vector<1x256xi32>
    %c240_i32 = arith.constant 240 : i32
    %24 = vector.broadcast %c240_i32 : i32 to vector<1x256xi32>
    %25 = arith.cmpi slt, %5, %24 : vector<1x256xi32>
    %c1_i32_9 = arith.constant 1 : i32
    %26 = vector.broadcast %c1_i32_9 : i32 to vector<1x256xi32>
    %27 = arith.cmpi sge, %21, %26 : vector<1x256xi32>
    %c14_i32 = arith.constant 14 : i32
    %28 = vector.broadcast %c14_i32 : i32 to vector<1x256xi32>
    %29 = arith.cmpi sle, %21, %28 : vector<1x256xi32>
    %30 = arith.andi %23, %27 : vector<1x256xi1>
    %31 = arith.andi %23, %29 : vector<1x256xi1>
    %32 = arith.andi %25, %27 : vector<1x256xi1>
    %33 = arith.andi %25, %29 : vector<1x256xi1>
    %c17_i32 = arith.constant 17 : i32
    %34 = tpu.dynamic_rotate %4 by %c17_i32 dim 1 : vector<34x256xf32>, i32 -> vector<34x256xf32>
    %cst = arith.constant 0.000000e+00 : f32
    %35 = vector.shape_cast %30 : vector<1x256xi1> to vector<1x256xi1>
    %36 = vector.broadcast %35 : vector<1x256xi1> to vector<34x256xi1>
    %37 = vector.broadcast %cst : f32 to vector<34x256xf32>
    %38 = arith.select %36, %34, %37 : vector<34x256xi1>, vector<34x256xf32>
    %c0_10 = arith.constant 0 : index
    %c0_11 = arith.constant 0 : index
    %c0_12 = arith.constant 0 : index
    %39 = vector.load %arg3[%c0_10, %c0_11, %c0_12] : memref<9x48x34xf32, #tpu.memory_space<vmem>>, vector<1x48x34xf32>
    %40 = vector.shape_cast %39 : vector<1x48x34xf32> to vector<48x34xf32>
    %cst_13 = arith.constant dense<0.000000e+00> : vector<48x256xf32>
    %41 = tpu.matmul %40, %38, %cst_13 {dimension_numbers = #tpu.dot_dimension_numbers<[1], [0], [0], [1], [0, 0, 1, 1], [], []>} : vector<48x34xf32>, vector<34x256xf32>, vector<48x256xf32> -> vector<48x256xf32>
    %c16_i32_14 = arith.constant 16 : i32
    %42 = tpu.dynamic_rotate %4 by %c16_i32_14 dim 1 : vector<34x256xf32>, i32 -> vector<34x256xf32>
    %cst_15 = arith.constant 0.000000e+00 : f32
    %43 = vector.shape_cast %23 : vector<1x256xi1> to vector<1x256xi1>
    %44 = vector.broadcast %43 : vector<1x256xi1> to vector<34x256xi1>
    %45 = vector.broadcast %cst_15 : f32 to vector<34x256xf32>
    %46 = arith.select %44, %42, %45 : vector<34x256xi1>, vector<34x256xf32>
    %c1 = arith.constant 1 : index
    %c0_16 = arith.constant 0 : index
    %c0_17 = arith.constant 0 : index
    %47 = vector.load %arg3[%c1, %c0_16, %c0_17] : memref<9x48x34xf32, #tpu.memory_space<vmem>>, vector<1x48x34xf32>
    %48 = vector.shape_cast %47 : vector<1x48x34xf32> to vector<48x34xf32>
    %cst_18 = arith.constant dense<0.000000e+00> : vector<48x256xf32>
    %49 = tpu.matmul %48, %46, %cst_18 {dimension_numbers = #tpu.dot_dimension_numbers<[1], [0], [0], [1], [0, 0, 1, 1], [], []>} : vector<48x34xf32>, vector<34x256xf32>, vector<48x256xf32> -> vector<48x256xf32>
    %50 = arith.addf %41, %49 : vector<48x256xf32>
    %c15_i32 = arith.constant 15 : i32
    %51 = tpu.dynamic_rotate %4 by %c15_i32 dim 1 : vector<34x256xf32>, i32 -> vector<34x256xf32>
    %cst_19 = arith.constant 0.000000e+00 : f32
    %52 = vector.shape_cast %31 : vector<1x256xi1> to vector<1x256xi1>
    %53 = vector.broadcast %52 : vector<1x256xi1> to vector<34x256xi1>
    %54 = vector.broadcast %cst_19 : f32 to vector<34x256xf32>
    %55 = arith.select %53, %51, %54 : vector<34x256xi1>, vector<34x256xf32>
    %c2 = arith.constant 2 : index
    %c0_20 = arith.constant 0 : index
    %c0_21 = arith.constant 0 : index
    %56 = vector.load %arg3[%c2, %c0_20, %c0_21] : memref<9x48x34xf32, #tpu.memory_space<vmem>>, vector<1x48x34xf32>
    %57 = vector.shape_cast %56 : vector<1x48x34xf32> to vector<48x34xf32>
    %cst_22 = arith.constant dense<0.000000e+00> : vector<48x256xf32>
    %58 = tpu.matmul %57, %55, %cst_22 {dimension_numbers = #tpu.dot_dimension_numbers<[1], [0], [0], [1], [0, 0, 1, 1], [], []>} : vector<48x34xf32>, vector<34x256xf32>, vector<48x256xf32> -> vector<48x256xf32>
    %59 = arith.addf %50, %58 : vector<48x256xf32>
    %c1_i32_23 = arith.constant 1 : i32
    %60 = tpu.dynamic_rotate %4 by %c1_i32_23 dim 1 : vector<34x256xf32>, i32 -> vector<34x256xf32>
    %cst_24 = arith.constant 0.000000e+00 : f32
    %61 = vector.shape_cast %27 : vector<1x256xi1> to vector<1x256xi1>
    %62 = vector.broadcast %61 : vector<1x256xi1> to vector<34x256xi1>
    %63 = vector.broadcast %cst_24 : f32 to vector<34x256xf32>
    %64 = arith.select %62, %60, %63 : vector<34x256xi1>, vector<34x256xf32>
    %c3 = arith.constant 3 : index
    %c0_25 = arith.constant 0 : index
    %c0_26 = arith.constant 0 : index
    %65 = vector.load %arg3[%c3, %c0_25, %c0_26] : memref<9x48x34xf32, #tpu.memory_space<vmem>>, vector<1x48x34xf32>
    %66 = vector.shape_cast %65 : vector<1x48x34xf32> to vector<48x34xf32>
    %cst_27 = arith.constant dense<0.000000e+00> : vector<48x256xf32>
    %67 = tpu.matmul %66, %64, %cst_27 {dimension_numbers = #tpu.dot_dimension_numbers<[1], [0], [0], [1], [0, 0, 1, 1], [], []>} : vector<48x34xf32>, vector<34x256xf32>, vector<48x256xf32> -> vector<48x256xf32>
    %68 = arith.addf %59, %67 : vector<48x256xf32>
    %c4 = arith.constant 4 : index
    %c0_28 = arith.constant 0 : index
    %c0_29 = arith.constant 0 : index
    %69 = vector.load %arg3[%c4, %c0_28, %c0_29] : memref<9x48x34xf32, #tpu.memory_space<vmem>>, vector<1x48x34xf32>
    %70 = vector.shape_cast %69 : vector<1x48x34xf32> to vector<48x34xf32>
    %cst_30 = arith.constant dense<0.000000e+00> : vector<48x256xf32>
    %71 = tpu.matmul %70, %4, %cst_30 {dimension_numbers = #tpu.dot_dimension_numbers<[1], [0], [0], [1], [0, 0, 1, 1], [], []>} : vector<48x34xf32>, vector<34x256xf32>, vector<48x256xf32> -> vector<48x256xf32>
    %72 = arith.addf %68, %71 : vector<48x256xf32>
    %c255_i32 = arith.constant 255 : i32
    %73 = tpu.dynamic_rotate %4 by %c255_i32 dim 1 : vector<34x256xf32>, i32 -> vector<34x256xf32>
    %cst_31 = arith.constant 0.000000e+00 : f32
    %74 = vector.shape_cast %29 : vector<1x256xi1> to vector<1x256xi1>
    %75 = vector.broadcast %74 : vector<1x256xi1> to vector<34x256xi1>
    %76 = vector.broadcast %cst_31 : f32 to vector<34x256xf32>
    %77 = arith.select %75, %73, %76 : vector<34x256xi1>, vector<34x256xf32>
    %c5 = arith.constant 5 : index
    %c0_32 = arith.constant 0 : index
    %c0_33 = arith.constant 0 : index
    %78 = vector.load %arg3[%c5, %c0_32, %c0_33] : memref<9x48x34xf32, #tpu.memory_space<vmem>>, vector<1x48x34xf32>
    %79 = vector.shape_cast %78 : vector<1x48x34xf32> to vector<48x34xf32>
    %cst_34 = arith.constant dense<0.000000e+00> : vector<48x256xf32>
    %80 = tpu.matmul %79, %77, %cst_34 {dimension_numbers = #tpu.dot_dimension_numbers<[1], [0], [0], [1], [0, 0, 1, 1], [], []>} : vector<48x34xf32>, vector<34x256xf32>, vector<48x256xf32> -> vector<48x256xf32>
    %81 = arith.addf %72, %80 : vector<48x256xf32>
    %c241_i32 = arith.constant 241 : i32
    %82 = tpu.dynamic_rotate %4 by %c241_i32 dim 1 : vector<34x256xf32>, i32 -> vector<34x256xf32>
    %cst_35 = arith.constant 0.000000e+00 : f32
    %83 = vector.shape_cast %32 : vector<1x256xi1> to vector<1x256xi1>
    %84 = vector.broadcast %83 : vector<1x256xi1> to vector<34x256xi1>
    %85 = vector.broadcast %cst_35 : f32 to vector<34x256xf32>
    %86 = arith.select %84, %82, %85 : vector<34x256xi1>, vector<34x256xf32>
    %c6 = arith.constant 6 : index
    %c0_36 = arith.constant 0 : index
    %c0_37 = arith.constant 0 : index
    %87 = vector.load %arg3[%c6, %c0_36, %c0_37] : memref<9x48x34xf32, #tpu.memory_space<vmem>>, vector<1x48x34xf32>
    %88 = vector.shape_cast %87 : vector<1x48x34xf32> to vector<48x34xf32>
    %cst_38 = arith.constant dense<0.000000e+00> : vector<48x256xf32>
    %89 = tpu.matmul %88, %86, %cst_38 {dimension_numbers = #tpu.dot_dimension_numbers<[1], [0], [0], [1], [0, 0, 1, 1], [], []>} : vector<48x34xf32>, vector<34x256xf32>, vector<48x256xf32> -> vector<48x256xf32>
    %90 = arith.addf %81, %89 : vector<48x256xf32>
    %c240_i32_39 = arith.constant 240 : i32
    %91 = tpu.dynamic_rotate %4 by %c240_i32_39 dim 1 : vector<34x256xf32>, i32 -> vector<34x256xf32>
    %cst_40 = arith.constant 0.000000e+00 : f32
    %92 = vector.shape_cast %25 : vector<1x256xi1> to vector<1x256xi1>
    %93 = vector.broadcast %92 : vector<1x256xi1> to vector<34x256xi1>
    %94 = vector.broadcast %cst_40 : f32 to vector<34x256xf32>
    %95 = arith.select %93, %91, %94 : vector<34x256xi1>, vector<34x256xf32>
    %c7 = arith.constant 7 : index
    %c0_41 = arith.constant 0 : index
    %c0_42 = arith.constant 0 : index
    %96 = vector.load %arg3[%c7, %c0_41, %c0_42] : memref<9x48x34xf32, #tpu.memory_space<vmem>>, vector<1x48x34xf32>
    %97 = vector.shape_cast %96 : vector<1x48x34xf32> to vector<48x34xf32>
    %cst_43 = arith.constant dense<0.000000e+00> : vector<48x256xf32>
    %98 = tpu.matmul %97, %95, %cst_43 {dimension_numbers = #tpu.dot_dimension_numbers<[1], [0], [0], [1], [0, 0, 1, 1], [], []>} : vector<48x34xf32>, vector<34x256xf32>, vector<48x256xf32> -> vector<48x256xf32>
    %99 = arith.addf %90, %98 : vector<48x256xf32>
    %c239_i32 = arith.constant 239 : i32
    %100 = tpu.dynamic_rotate %4 by %c239_i32 dim 1 : vector<34x256xf32>, i32 -> vector<34x256xf32>
    %cst_44 = arith.constant 0.000000e+00 : f32
    %101 = vector.shape_cast %33 : vector<1x256xi1> to vector<1x256xi1>
    %102 = vector.broadcast %101 : vector<1x256xi1> to vector<34x256xi1>
    %103 = vector.broadcast %cst_44 : f32 to vector<34x256xf32>
    %104 = arith.select %102, %100, %103 : vector<34x256xi1>, vector<34x256xf32>
    %c8 = arith.constant 8 : index
    %c0_45 = arith.constant 0 : index
    %c0_46 = arith.constant 0 : index
    %105 = vector.load %arg3[%c8, %c0_45, %c0_46] : memref<9x48x34xf32, #tpu.memory_space<vmem>>, vector<1x48x34xf32>
    %106 = vector.shape_cast %105 : vector<1x48x34xf32> to vector<48x34xf32>
    %cst_47 = arith.constant dense<0.000000e+00> : vector<48x256xf32>
    %107 = tpu.matmul %106, %104, %cst_47 {dimension_numbers = #tpu.dot_dimension_numbers<[1], [0], [0], [1], [0, 0, 1, 1], [], []>} : vector<48x34xf32>, vector<34x256xf32>, vector<48x256xf32> -> vector<48x256xf32>
    %108 = arith.addf %99, %107 : vector<48x256xf32>
    %c0_48 = arith.constant 0 : index
    %c0_49 = arith.constant 0 : index
    %109 = vector.load %arg4[%c0_48, %c0_49] : memref<48x1xf32, #tpu.memory_space<vmem>>, vector<48x1xf32>
    %110 = vector.broadcast %109 : vector<48x1xf32> to vector<48x256xf32>
    %111 = arith.addf %108, %110 : vector<48x256xf32>
    %cst_50 = arith.constant 0.000000e+00 : f32
    %112 = vector.broadcast %cst_50 : f32 to vector<48x256xf32>
    %113 = arith.maximumf %111, %112 : vector<48x256xf32>
    %c17_i32_51 = arith.constant 17 : i32
    %114 = tpu.dynamic_rotate %113 by %c17_i32_51 dim 1 : vector<48x256xf32>, i32 -> vector<48x256xf32>
    %cst_52 = arith.constant 0.000000e+00 : f32
    %115 = vector.shape_cast %30 : vector<1x256xi1> to vector<1x256xi1>
    %116 = vector.broadcast %115 : vector<1x256xi1> to vector<48x256xi1>
    %117 = vector.broadcast %cst_52 : f32 to vector<48x256xf32>
    %118 = arith.select %116, %114, %117 : vector<48x256xi1>, vector<48x256xf32>
    %c0_53 = arith.constant 0 : index
    %c0_54 = arith.constant 0 : index
    %c0_55 = arith.constant 0 : index
    %119 = vector.load %arg5[%c0_53, %c0_54, %c0_55] : memref<9x32x48xf32, #tpu.memory_space<vmem>>, vector<1x32x48xf32>
    %120 = vector.shape_cast %119 : vector<1x32x48xf32> to vector<32x48xf32>
    %cst_56 = arith.constant dense<0.000000e+00> : vector<32x256xf32>
    %121 = tpu.matmul %120, %118, %cst_56 {dimension_numbers = #tpu.dot_dimension_numbers<[1], [0], [0], [1], [0, 0, 1, 1], [], []>} : vector<32x48xf32>, vector<48x256xf32>, vector<32x256xf32> -> vector<32x256xf32>
    %c16_i32_57 = arith.constant 16 : i32
    %122 = tpu.dynamic_rotate %113 by %c16_i32_57 dim 1 : vector<48x256xf32>, i32 -> vector<48x256xf32>
    %cst_58 = arith.constant 0.000000e+00 : f32
    %123 = vector.shape_cast %23 : vector<1x256xi1> to vector<1x256xi1>
    %124 = vector.broadcast %123 : vector<1x256xi1> to vector<48x256xi1>
    %125 = vector.broadcast %cst_58 : f32 to vector<48x256xf32>
    %126 = arith.select %124, %122, %125 : vector<48x256xi1>, vector<48x256xf32>
    %c1_59 = arith.constant 1 : index
    %c0_60 = arith.constant 0 : index
    %c0_61 = arith.constant 0 : index
    %127 = vector.load %arg5[%c1_59, %c0_60, %c0_61] : memref<9x32x48xf32, #tpu.memory_space<vmem>>, vector<1x32x48xf32>
    %128 = vector.shape_cast %127 : vector<1x32x48xf32> to vector<32x48xf32>
    %cst_62 = arith.constant dense<0.000000e+00> : vector<32x256xf32>
    %129 = tpu.matmul %128, %126, %cst_62 {dimension_numbers = #tpu.dot_dimension_numbers<[1], [0], [0], [1], [0, 0, 1, 1], [], []>} : vector<32x48xf32>, vector<48x256xf32>, vector<32x256xf32> -> vector<32x256xf32>
    %130 = arith.addf %121, %129 : vector<32x256xf32>
    %c15_i32_63 = arith.constant 15 : i32
    %131 = tpu.dynamic_rotate %113 by %c15_i32_63 dim 1 : vector<48x256xf32>, i32 -> vector<48x256xf32>
    %cst_64 = arith.constant 0.000000e+00 : f32
    %132 = vector.shape_cast %31 : vector<1x256xi1> to vector<1x256xi1>
    %133 = vector.broadcast %132 : vector<1x256xi1> to vector<48x256xi1>
    %134 = vector.broadcast %cst_64 : f32 to vector<48x256xf32>
    %135 = arith.select %133, %131, %134 : vector<48x256xi1>, vector<48x256xf32>
    %c2_65 = arith.constant 2 : index
    %c0_66 = arith.constant 0 : index
    %c0_67 = arith.constant 0 : index
    %136 = vector.load %arg5[%c2_65, %c0_66, %c0_67] : memref<9x32x48xf32, #tpu.memory_space<vmem>>, vector<1x32x48xf32>
    %137 = vector.shape_cast %136 : vector<1x32x48xf32> to vector<32x48xf32>
    %cst_68 = arith.constant dense<0.000000e+00> : vector<32x256xf32>
    %138 = tpu.matmul %137, %135, %cst_68 {dimension_numbers = #tpu.dot_dimension_numbers<[1], [0], [0], [1], [0, 0, 1, 1], [], []>} : vector<32x48xf32>, vector<48x256xf32>, vector<32x256xf32> -> vector<32x256xf32>
    %139 = arith.addf %130, %138 : vector<32x256xf32>
    %c1_i32_69 = arith.constant 1 : i32
    %140 = tpu.dynamic_rotate %113 by %c1_i32_69 dim 1 : vector<48x256xf32>, i32 -> vector<48x256xf32>
    %cst_70 = arith.constant 0.000000e+00 : f32
    %141 = vector.shape_cast %27 : vector<1x256xi1> to vector<1x256xi1>
    %142 = vector.broadcast %141 : vector<1x256xi1> to vector<48x256xi1>
    %143 = vector.broadcast %cst_70 : f32 to vector<48x256xf32>
    %144 = arith.select %142, %140, %143 : vector<48x256xi1>, vector<48x256xf32>
    %c3_71 = arith.constant 3 : index
    %c0_72 = arith.constant 0 : index
    %c0_73 = arith.constant 0 : index
    %145 = vector.load %arg5[%c3_71, %c0_72, %c0_73] : memref<9x32x48xf32, #tpu.memory_space<vmem>>, vector<1x32x48xf32>
    %146 = vector.shape_cast %145 : vector<1x32x48xf32> to vector<32x48xf32>
    %cst_74 = arith.constant dense<0.000000e+00> : vector<32x256xf32>
    %147 = tpu.matmul %146, %144, %cst_74 {dimension_numbers = #tpu.dot_dimension_numbers<[1], [0], [0], [1], [0, 0, 1, 1], [], []>} : vector<32x48xf32>, vector<48x256xf32>, vector<32x256xf32> -> vector<32x256xf32>
    %148 = arith.addf %139, %147 : vector<32x256xf32>
    %c4_75 = arith.constant 4 : index
    %c0_76 = arith.constant 0 : index
    %c0_77 = arith.constant 0 : index
    %149 = vector.load %arg5[%c4_75, %c0_76, %c0_77] : memref<9x32x48xf32, #tpu.memory_space<vmem>>, vector<1x32x48xf32>
    %150 = vector.shape_cast %149 : vector<1x32x48xf32> to vector<32x48xf32>
    %cst_78 = arith.constant dense<0.000000e+00> : vector<32x256xf32>
    %151 = tpu.matmul %150, %113, %cst_78 {dimension_numbers = #tpu.dot_dimension_numbers<[1], [0], [0], [1], [0, 0, 1, 1], [], []>} : vector<32x48xf32>, vector<48x256xf32>, vector<32x256xf32> -> vector<32x256xf32>
    %152 = arith.addf %148, %151 : vector<32x256xf32>
    %c255_i32_79 = arith.constant 255 : i32
    %153 = tpu.dynamic_rotate %113 by %c255_i32_79 dim 1 : vector<48x256xf32>, i32 -> vector<48x256xf32>
    %cst_80 = arith.constant 0.000000e+00 : f32
    %154 = vector.shape_cast %29 : vector<1x256xi1> to vector<1x256xi1>
    %155 = vector.broadcast %154 : vector<1x256xi1> to vector<48x256xi1>
    %156 = vector.broadcast %cst_80 : f32 to vector<48x256xf32>
    %157 = arith.select %155, %153, %156 : vector<48x256xi1>, vector<48x256xf32>
    %c5_81 = arith.constant 5 : index
    %c0_82 = arith.constant 0 : index
    %c0_83 = arith.constant 0 : index
    %158 = vector.load %arg5[%c5_81, %c0_82, %c0_83] : memref<9x32x48xf32, #tpu.memory_space<vmem>>, vector<1x32x48xf32>
    %159 = vector.shape_cast %158 : vector<1x32x48xf32> to vector<32x48xf32>
    %cst_84 = arith.constant dense<0.000000e+00> : vector<32x256xf32>
    %160 = tpu.matmul %159, %157, %cst_84 {dimension_numbers = #tpu.dot_dimension_numbers<[1], [0], [0], [1], [0, 0, 1, 1], [], []>} : vector<32x48xf32>, vector<48x256xf32>, vector<32x256xf32> -> vector<32x256xf32>
    %161 = arith.addf %152, %160 : vector<32x256xf32>
    %c241_i32_85 = arith.constant 241 : i32
    %162 = tpu.dynamic_rotate %113 by %c241_i32_85 dim 1 : vector<48x256xf32>, i32 -> vector<48x256xf32>
    %cst_86 = arith.constant 0.000000e+00 : f32
    %163 = vector.shape_cast %32 : vector<1x256xi1> to vector<1x256xi1>
    %164 = vector.broadcast %163 : vector<1x256xi1> to vector<48x256xi1>
    %165 = vector.broadcast %cst_86 : f32 to vector<48x256xf32>
    %166 = arith.select %164, %162, %165 : vector<48x256xi1>, vector<48x256xf32>
    %c6_87 = arith.constant 6 : index
    %c0_88 = arith.constant 0 : index
    %c0_89 = arith.constant 0 : index
    %167 = vector.load %arg5[%c6_87, %c0_88, %c0_89] : memref<9x32x48xf32, #tpu.memory_space<vmem>>, vector<1x32x48xf32>
    %168 = vector.shape_cast %167 : vector<1x32x48xf32> to vector<32x48xf32>
    %cst_90 = arith.constant dense<0.000000e+00> : vector<32x256xf32>
    %169 = tpu.matmul %168, %166, %cst_90 {dimension_numbers = #tpu.dot_dimension_numbers<[1], [0], [0], [1], [0, 0, 1, 1], [], []>} : vector<32x48xf32>, vector<48x256xf32>, vector<32x256xf32> -> vector<32x256xf32>
    %170 = arith.addf %161, %169 : vector<32x256xf32>
    %c240_i32_91 = arith.constant 240 : i32
    %171 = tpu.dynamic_rotate %113 by %c240_i32_91 dim 1 : vector<48x256xf32>, i32 -> vector<48x256xf32>
    %cst_92 = arith.constant 0.000000e+00 : f32
    %172 = vector.shape_cast %25 : vector<1x256xi1> to vector<1x256xi1>
    %173 = vector.broadcast %172 : vector<1x256xi1> to vector<48x256xi1>
    %174 = vector.broadcast %cst_92 : f32 to vector<48x256xf32>
    %175 = arith.select %173, %171, %174 : vector<48x256xi1>, vector<48x256xf32>
    %c7_93 = arith.constant 7 : index
    %c0_94 = arith.constant 0 : index
    %c0_95 = arith.constant 0 : index
    %176 = vector.load %arg5[%c7_93, %c0_94, %c0_95] : memref<9x32x48xf32, #tpu.memory_space<vmem>>, vector<1x32x48xf32>
    %177 = vector.shape_cast %176 : vector<1x32x48xf32> to vector<32x48xf32>
    %cst_96 = arith.constant dense<0.000000e+00> : vector<32x256xf32>
    %178 = tpu.matmul %177, %175, %cst_96 {dimension_numbers = #tpu.dot_dimension_numbers<[1], [0], [0], [1], [0, 0, 1, 1], [], []>} : vector<32x48xf32>, vector<48x256xf32>, vector<32x256xf32> -> vector<32x256xf32>
    %179 = arith.addf %170, %178 : vector<32x256xf32>
    %c239_i32_97 = arith.constant 239 : i32
    %180 = tpu.dynamic_rotate %113 by %c239_i32_97 dim 1 : vector<48x256xf32>, i32 -> vector<48x256xf32>
    %cst_98 = arith.constant 0.000000e+00 : f32
    %181 = vector.shape_cast %33 : vector<1x256xi1> to vector<1x256xi1>
    %182 = vector.broadcast %181 : vector<1x256xi1> to vector<48x256xi1>
    %183 = vector.broadcast %cst_98 : f32 to vector<48x256xf32>
    %184 = arith.select %182, %180, %183 : vector<48x256xi1>, vector<48x256xf32>
    %c8_99 = arith.constant 8 : index
    %c0_100 = arith.constant 0 : index
    %c0_101 = arith.constant 0 : index
    %185 = vector.load %arg5[%c8_99, %c0_100, %c0_101] : memref<9x32x48xf32, #tpu.memory_space<vmem>>, vector<1x32x48xf32>
    %186 = vector.shape_cast %185 : vector<1x32x48xf32> to vector<32x48xf32>
    %cst_102 = arith.constant dense<0.000000e+00> : vector<32x256xf32>
    %187 = tpu.matmul %186, %184, %cst_102 {dimension_numbers = #tpu.dot_dimension_numbers<[1], [0], [0], [1], [0, 0, 1, 1], [], []>} : vector<32x48xf32>, vector<48x256xf32>, vector<32x256xf32> -> vector<32x256xf32>
    %188 = arith.addf %179, %187 : vector<32x256xf32>
    %c0_103 = arith.constant 0 : index
    %c0_104 = arith.constant 0 : index
    %189 = vector.load %arg6[%c0_103, %c0_104] : memref<32x1xf32, #tpu.memory_space<vmem>>, vector<32x1xf32>
    %190 = vector.broadcast %189 : vector<32x1xf32> to vector<32x256xf32>
    %191 = arith.addf %188, %190 : vector<32x256xf32>
    %cst_105 = arith.constant 0.000000e+00 : f32
    %192 = vector.broadcast %cst_105 : f32 to vector<32x256xf32>
    %193 = arith.maximumf %191, %192 : vector<32x256xf32>
    %c0_106 = arith.constant 0 : index
    %c0_107 = arith.constant 0 : index
    %c0_108 = arith.constant 0 : index
    %194 = vector.load %arg7[%c0_106, %c0_107, %c0_108] : memref<1x32x256xf32, #tpu.memory_space<vmem>>, vector<1x32x256xf32>
    %195 = vector.shape_cast %194 : vector<1x32x256xf32> to vector<32x256xf32>
    %196 = vector.shape_cast %193 : vector<32x256xf32> to vector<1x32x256xf32>
    tpu.vector_store %arg7[%c0_106, %c0_107, %c0_108], %196 {strides = array<i32>} : memref<1x32x256xf32, #tpu.memory_space<vmem>>, vector<1x32x256xf32>,
    return
  }
  func.func @transform_0(%arg0: i32) -> (i32, i32, i32) {
    %c0_i32 = arith.constant 0 : i32
    %c0_i32_0 = arith.constant 0 : i32
    %c0_i32_1 = arith.constant 0 : i32
    return %arg0, %c0_i32, %c0_i32_0 : i32, i32, i32
  }
  func.func @transform_1(%arg0: i32) -> (i32, i32, i32) {
    %c0_i32 = arith.constant 0 : i32
    %c0_i32_0 = arith.constant 0 : i32
    %c0_i32_1 = arith.constant 0 : i32
    return %arg0, %c0_i32, %c0_i32_0 : i32, i32, i32
  }
  func.func @transform_2(%arg0: i32) -> (i32, i32, i32) {
    %c0_i32 = arith.constant 0 : i32
    %c0_i32_0 = arith.constant 0 : i32
    %c0_i32_1 = arith.constant 0 : i32
    %c0_i32_2 = arith.constant 0 : i32
    return %c0_i32, %c0_i32_0, %c0_i32_1 : i32, i32, i32
  }
  func.func @transform_3(%arg0: i32) -> (i32, i32) {
    %c0_i32 = arith.constant 0 : i32
    %c0_i32_0 = arith.constant 0 : i32
    %c0_i32_1 = arith.constant 0 : i32
    return %c0_i32, %c0_i32_0 : i32, i32
  }
  func.func @transform_4(%arg0: i32) -> (i32, i32, i32) {
    %c0_i32 = arith.constant 0 : i32
    %c0_i32_0 = arith.constant 0 : i32
    %c0_i32_1 = arith.constant 0 : i32
    %c0_i32_2 = arith.constant 0 : i32
    return %c0_i32, %c0_i32_0, %c0_i32_1 : i32, i32, i32
  }
  func.func @transform_5(%arg0: i32) -> (i32, i32) {
    %c0_i32 = arith.constant 0 : i32
    %c0_i32_0 = arith.constant 0 : i32
    %c0_i32_1 = arith.constant 0 : i32
    return %c0_i32, %c0_i32_0 : i32, i32
  }
  func.func @transform_6(%arg0: i32) -> (i32, i32, i32) {
    %c0_i32 = arith.constant 0 : i32
    %c0_i32_0 = arith.constant 0 : i32
    %c0_i32_1 = arith.constant 0 : i32
    return %arg0, %c0_i32, %c0_i32_0 : i32, i32, i32
  }
}

</mosaic_0001>

<bundles_post_ra>
// kernel: feature_adjuster.1
= control target key start
LH: loop header
LB: loop body
LE: loop exit
PB: predicated region body
PF: predicated region fallthrough
CT: control target
= control target key end

     0   :  { %s4769_s21 = smov 0   ;;  %s6324_s0 = inlined_call_operand.vmem [shape: f32[2,32,256], index: 0, kind: input, shape index: {}]   ;;  %s6325_s1 = inlined_call_operand.vmem [shape: f32[2,2,256], index: 1, kind: input, shape index: {}]   ;;  %s6326_s2 = inlined_call_operand.vmem [shape: f32[9,48,34], index: 2, kind: input, shape index: {}]   ;;  %s6327_s3 = inlined_call_operand.vmem [shape: f32[48,1], index: 3, kind: input, shape index: {}]   ;;  %s6328_s4 = inlined_call_operand.vmem [shape: f32[9,32,48], index: 4, kind: input, shape index: {}]   ;;  %s6329_s5 = inlined_call_operand.vmem [shape: f32[32,1], index: 5, kind: input, shape index: {}]   ;;  %s6330_s6 = inlined_call_operand.vmem [shape: f32[2,32,256], index: 6, kind: output, shape index: {}]  }
   0x1 LB: > { %s3535_s22 = sadd.s32 4294967295, %s4722_s21   ;;  %p3539_p0 = scmp.ge.s32.totalorder %s4722_s21, 1  ;;  %s4722_s21 = sphi %s4769_s21, %s16_s21  }
   0x2   : > { %p222_p1 = scmp.lt.s32.totalorder %s4722_s21, 3 }
   0x4   : > { %p223_p2 = pnand %p3539_p0, %p222_p1 }
   0x5   : > { %p257_p3 = scmp.lt.s32.totalorder (!%p223_p2), %s3535_s22, 1  ;;  %s4724_s7 = smov (!%p223_p2), 17   ;;  %v4725_v14 = vmov (!%p223_p2), 0.0   ;;  %v292_v19 = vlaneseq (!%p223_p2)  ;;  %vm6335_vm8 = vcmask (!%p223_p2), 1041408   ;;  %vm6336_vm13 = vcmask (!%p223_p2), 277504   ;;  %v3642_v28 = vld [vmem:[%s6326_s2 + $0x108] sm:$0xff] (!%p223_p2) }
   0x6   : > { %226 = sbr.rel (%p223_p2) target bundleno = 1033 (0x409), region = 44  ;;  %653 = vmatprep.mubr.f32.mxu0 (!%p223_p2), %v4725_v14  ;;  %528 = vmatprep.mubr.f32.mxu1 (!%p223_p2), %v4725_v14  ;;  %s4726_s8 = smov (!%p223_p2), 15   ;;  %v3687_v59 = vld [vmem:[%s6326_s2 + $0x170] sm:$0xff] (!%p223_p2) }
   0x7   : > { %s4727_s9 = smov (!%p223_p2), 1   ;;  %s4728_s10 = smov (!%p223_p2), 127   ;;  %v4913_v20 = vand.u32 (!%p223_p2), 127, %v292_v19 }
   0x8   : > { %s4729_s11 = smov (!%p223_p2), 113   ;;  %s4730_s12 = smov (!%p223_p2), 112  }
   0x9   : > { %s4731_s13 = smov (!%p223_p2), 16   ;;  %s4732_s14 = smov (!%p223_p2), 111   ;;  %v4916_v21 = vadd.s32 (!%p223_p2), 128, %v4913_v20  ;;  %v299_v22 = vand.u32 (!%p223_p2), 15, %v4913_v20  ;;  %vm319_vm0 = vcmp.ge.s32.totalorder (!%p223_p2), %v4913_v20, 16  ;;  %vm6333_vm2 = vcmp.lt.s32.totalorder (!%p223_p2), %v4913_v20, 17 }
   0xa   : > { %vm6332_vm7 = vcmp.lt.s32.totalorder (!%p223_p2), %v4913_v20, 15  ;;  %vm6331_vm15 = vcmp.lt.s32.totalorder (!%p223_p2), %v4913_v20, 1 }
   0xb   : > { %v306_v25 = vand.u32 (!%p223_p2), 15, %v4916_v21  ;;  %vm4921_vm1 = vcmp.ge.s32.totalorder (!%p223_p2), %v299_v22, 1  ;;  %vm4986_vm9 = vcmp.le.s32.totalorder (!%p223_p2), %v299_v22, 14 }
   0xc   : > { %vm4934_vm4 = vmand (!%p223_p2), %vm319_vm0, %vm4921_vm1 }
   0xd   : > { %s6512_s22 = smov (!%p257_p3, %s3535_s22), 1  ;;  %vm4926_vm3 = vcmp.ge.s32.totalorder %v306_v25, 1  ;;  %vm4964_vm6 = vmpackc.low %vm4934_vm4, %vm4934_vm4  ;;  %vm4998_vm10 = vcmp.le.s32.totalorder %v306_v25, 14 }
   0xe   : > { %s3877_s23 = sshll.u32 %s6512_s22, 6  ;;  %s3878_s24 = sshll.u32 %s6512_s22, 2  ;;  %vm4949_vm5 = vmpackc.low %vm4926_vm3, %vm4926_vm3 }
   0xf   : > { %s261_s27 = scalar_lea.vmem %s6324_s0, %s3877_s23  ;;  %s266_s30 = scalar_lea.vmem %s6325_s1, %s3878_s24  ;;  %vm5017_vm11 = vmand %vm319_vm0, %vm4986_vm9 }
  0x10   : > { %v4789_v0 = vld [vmem:[%s261_s27 + $0x20] sm:$0xff]  ;;  %v4791_v1 = vld [vmem:[%s261_s27 + $0x30] sm:$0xff]  ;;  %v4801_v5 = vld [vmem:[%s261_s27 + $0x28] sm:$0xff]  ;;  %s6311_s16 = scalar_lea.vmem %s6330_s6, %s3877_s23 }
  0x11   : > { %v4795_v2 = vpack.i.bf16 %v4791_v1, %v4789_v0  ;;  %v4797_v3 = vld [vmem:[%s261_s27] sm:$0xff]  ;;  %v4799_v4 = vld [vmem:[%s261_s27 + $0x10] sm:$0xff]  ;;  %v4807_v7 = vld [vmem:[%s261_s27 + $0x38] sm:$0xff]  ;;  %v3932_v18 = vpack.c.bf16 %v4791_v1, %v4789_v0 }
  0x12   : > { %v4805_v6 = vpack.i.bf16 %v4799_v4, %v4797_v3  ;;  %v4809_v8 = vld [vmem:[%s261_s27 + $0x8] sm:$0xff]  ;;  %v4811_v9 = vld [vmem:[%s261_s27 + $0x18] sm:$0xff]  ;;  %v4813_v10 = vld.sshfl [vmem:[%s266_s30] sm:$0x33 pattern:$0x76325410]  ;;  %v4329_v11 = vpack.i.bf16 %v4807_v7, %v4801_v5  ;;  %v3928_v16 = vpack.c.bf16 %v4799_v4, %v4797_v3  ;;  %v3930_v17 = vpack.c.bf16 %v4807_v7, %v4801_v5 }
  0x13   : > { %4325 = vrot.lane.b32.xlu1 %v4795_v2, %s4724_s7  ;;  %v4319_v12 = vpack.i.bf16 %v4811_v9, %v4809_v8  ;;  %v4825_v13 = vcombine.high %v4813_v10, %v4813_v10  ;;  %v3926_v15 = vpack.c.bf16 %v4811_v9, %v4809_v8  ;;  %vm5026_vm12 = vmpackc.low %vm4998_vm10, %vm4998_vm10  ;;  %v3586_v8 = vld [vmem:[%s6326_s2 + $0x88] sm:$0xff]  ;;  %v3605_v4 = vld [vmem:[%s6326_s2 + $0xa0] sm:$0xff] }
  0x14   : > { %4315 = vrot.lane.b32.xlu0 %v4805_v6, %s4724_s7  ;;  %vm5040_vm14 = vmpackc.low %vm5017_vm11, %vm5017_vm11 }
  0x17   : > { %4330 = vrot.lane.b32.xlu1 %v4329_v11, %s4724_s7 }
  0x18   : > { %4320 = vrot.lane.b32.xlu0 %v4319_v12, %s4724_s7 }
  0x1b   : > { %353 = vrot.lane.b32.xlu1 %v4825_v13, %s4724_s7 }
  0x1c   : > { %343 = vrot.lane.b32.xlu0 %v4813_v10, %s4724_s7 }
  0x1f   : > { %4340 = vrot.lane.b32.xlu1 %v4319_v12, %s4726_s8 }
  0x20   : > { %4335 = vrot.lane.b32.xlu0 %v4805_v6, %s4726_s8 }
  0x23   : > { %4350 = vrot.lane.b32.xlu1 %v4329_v11, %s4726_s8 }
  0x24   : > { %4345 = vrot.lane.b32.xlu0 %v4795_v2, %s4726_s8 }
  0x27   : > { %708 = vrot.lane.b32.xlu1 %v4825_v13, %s4726_s8 }
  0x28   : > { %698 = vrot.lane.b32.xlu0 %v4813_v10, %s4726_s8 }
  0x2b   : > { %4360 = vrot.lane.b32.xlu1 %v4319_v12, %s4727_s9 }
  0x2c   : > { %4355 = vrot.lane.b32.xlu0 %v4805_v6, %s4727_s9 }
  0x2f   : > { %4370 = vrot.lane.b32.xlu1 %v4329_v11, %s4727_s9 }
  0x30   : > { %4365 = vrot.lane.b32.xlu0 %v4795_v2, %s4727_s9 }
  0x33   : > { %897 = vrot.lane.b32.xlu1 %v4825_v13, %s4727_s9 }
  0x34   : > { %887 = vrot.lane.b32.xlu0 %v4813_v10, %s4727_s9 }
  0x37   : > { %4380 = vrot.lane.b32.xlu1 %v4319_v12, %s4728_s10 }
  0x38   : > { %4375 = vrot.lane.b32.xlu0 %v4805_v6, %s4728_s10 }
  0x3b   : > { %4390 = vrot.lane.b32.xlu1 %v4329_v11, %s4728_s10 }
  0x3c   : > { %4385 = vrot.lane.b32.xlu0 %v4795_v2, %s4728_s10 }
  0x3f   : > { %1228 = vrot.lane.b32.xlu1 %v4825_v13, %s4728_s10 }
  0x40   : > { %1218 = vrot.lane.b32.xlu0 %v4813_v10, %s4728_s10 }
  0x43   : > { %4400 = vrot.lane.b32.xlu1 %v4319_v12, %s4729_s11 }
  0x44   : > { %4395 = vrot.lane.b32.xlu0 %v4805_v6, %s4729_s11 }
  0x47   : > { %4410 = vrot.lane.b32.xlu1 %v4329_v11, %s4729_s11 }
  0x48   : > { %4405 = vrot.lane.b32.xlu0 %v4795_v2, %s4729_s11 }
  0x4b   : > { %1417 = vrot.lane.b32.xlu1 %v4825_v13, %s4729_s11 }
  0x4c   : > { %1407 = vrot.lane.b32.xlu0 %v4813_v10, %s4729_s11 }
  0x4f   : > { %4420 = vrot.lane.b32.xlu1 %v4319_v12, %s4730_s12 }
  0x50   : > { %4415 = vrot.lane.b32.xlu0 %v4805_v6, %s4730_s12 }
  0x53   : > { %4430 = vrot.lane.b32.xlu1 %v4329_v11, %s4730_s12 }
  0x54   : > { %4425 = vrot.lane.b32.xlu0 %v4795_v2, %s4730_s12 }
  0x57   : > { %1606 = vrot.lane.b32.xlu1 %v4825_v13, %s4730_s12 }
  0x58   : > { %1596 = vrot.lane.b32.xlu0 %v4813_v10, %s4730_s12 }
  0x5b   : > { %4440 = vrot.lane.b32.xlu1 %v4319_v12, %s4731_s13 }
  0x5c   : > { %4435 = vrot.lane.b32.xlu0 %v4805_v6, %s4731_s13 }
  0x5f   : > { %4450 = vrot.lane.b32.xlu1 %v4329_v11, %s4731_s13 }
  0x60   : > { %4445 = vrot.lane.b32.xlu0 %v4795_v2, %s4731_s13 }
  0x63   : > { %404 = vrot.lane.b32.xlu1 %v4825_v13, %s4731_s13 }
  0x64   : > { %394 = vrot.lane.b32.xlu0 %v4813_v10, %s4731_s13 }
  0x67   : > { %4460 = vrot.lane.b32.xlu1 %v4319_v12, %s4732_s14 }
  0x68   : > { %4455 = vrot.lane.b32.xlu0 %v4805_v6, %s4732_s14  ;;  %v3855_v6 = vld [vmem:[%s6328_s4 + $0x100] sm:$0xff] }
  0x6b   : > { %4470 = vrot.lane.b32.xlu1 %v4329_v11, %s4732_s14 }
  0x6c   : > { %4465 = vrot.lane.b32.xlu0 %v4795_v2, %s4732_s14 }
  0x6f   : > { %1795 = vrot.lane.b32.xlu1 %v4825_v13, %s4732_s14 }
  0x70   : > { %1785 = vrot.lane.b32.xlu0 %v4813_v10, %s4732_s14 }
  0x85   : > { %v4326_v23 = vpop.permute.xlu1 %4325 }
  0x86   : > { %v4316_v24 = vpop.permute.xlu0 %4315  ;;  %v4328_v26 = vunpack.i.h.bf16 %v4326_v23  ;;  %v4327_v27 = vunpack.i.l.bf16 %v4326_v23 }
  0x87   : > { %v4318_v34 = vunpack.i.h.bf16 %v4316_v24  ;;  %v4317_v35 = vunpack.i.l.bf16 %v4316_v24 }
  0x89   : > { %v4331_v29 = vpop.permute.xlu1 %4330 }
  0x8a   : > { %v4333_v30 = vunpack.i.h.bf16 %v4331_v29  ;;  %v4332_v31 = vunpack.i.l.bf16 %v4331_v29  ;;  %v4321_v32 = vpop.permute.xlu0 %4320 }
  0x8b   : > { %v4323_v36 = vunpack.i.h.bf16 %v4321_v32  ;;  %v4322_v37 = vunpack.i.l.bf16 %v4321_v32 }
  0x8c   : > { %v358_v39 = vsel %vm6333_vm2, %v4327_v27, %v4332_v31  ;;  %v359_v40 = vsel %vm6333_vm2, %v4328_v26, %v4333_v30  ;;  %v363_v51 = vsel %vm6333_vm2, %v4332_v31, %v4327_v27  ;;  %v364_v52 = vsel %vm6333_vm2, %v4333_v30, %v4328_v26 }
  0x8d   : > { %v354_v41 = vpop.permute.xlu1 %353  ;;  %v356_v42 = vsel %vm6333_vm2, %v4317_v35, %v4322_v37  ;;  %v357_v43 = vsel %vm6333_vm2, %v4318_v34, %v4323_v36  ;;  %v361_v45 = vsel %vm6333_vm2, %v4322_v37, %v4317_v35  ;;  %v362_v46 = vsel %vm6333_vm2, %v4323_v36, %v4318_v34  ;;  %v380_v35 = vld [vmem:[%s6326_s2] sm:$0xff] }
  0x8e   : > { %v344_v47 = vpop.permute.xlu0 %343  ;;  %v4957_v48 = vpack.c.bf16 %v357_v43, %v356_v42  ;;  %v4959_v49 = vpack.c.bf16 %v362_v46, %v361_v45  ;;  %v4977_v54 = vpack.c.bf16 %v359_v40, %v358_v39  ;;  %v4990_v62 = vpack.c.bf16 %v364_v52, %v363_v51  ;;  %v381_v51 = vld [vmem:[%s6326_s2 + $0x8] sm:$0xff] }
  0x8f   : > { %v360_v53 = vsel %vm6333_vm2, %v344_v47, %v354_v41  ;;  %v365_v2 = vsel %vm6333_vm2, %v354_v41, %v344_v47  ;;  %v6361_v37 = vmov 0  ;;  %vm5297_vm2 = vmpackc.low %vm319_vm0, %vm319_vm0 }
  0x90   : > { %3892 = vmatprep.subr.msk.bf16.mxu0 %vm4949_vm5, %v4957_v48  ;;  %v4994_v63 = vsel %vm4926_vm3, %v360_v53, 0.0  ;;  %v5035_v36 = vsel %vm4934_vm4, %v365_v2, 0.0  ;;  %v6362_v37 = vsel %vm5040_vm14, 4294967295, %v6361_v37  ;;  %v382_v2 = vld [vmem:[%s6326_s2 + $0x10] sm:$0xff]  ;;  %vm5099_vm4 = vmpackc.low %vm4921_vm1, %vm4921_vm1 }
  0x91   : > { %3895 = vmatpush1.bf16.msk.msra.mxu0 %vm4964_vm6, %v4959_v49  ;;  %v4341_v55 = vpop.permute.xlu1 %4340 }
  0x92   : > { %v4343_v56 = vunpack.i.h.bf16 %v4341_v55  ;;  %v4342_v57 = vunpack.i.l.bf16 %v4341_v55  ;;  %v4336_v58 = vpop.permute.xlu0 %4335  ;;  %3898 = vmatprep.subr.msk.bf16.mxu0 %vm4949_vm5, %v4977_v54 }
  0x93   : > { %v4338_v60 = vunpack.i.h.bf16 %v4336_v58  ;;  %v4337_v61 = vunpack.i.l.bf16 %v4336_v58 }
  0x95   : > { %v712_v11 = vsel %vm6332_vm7, %v4338_v60, %v4343_v56  ;;  %v717_v12 = vsel %vm6332_vm7, %v4343_v56, %v4338_v60  ;;  %v711_v19 = vsel %vm6332_vm7, %v4337_v61, %v4342_v57  ;;  %v716_v22 = vsel %vm6332_vm7, %v4342_v57, %v4337_v61  ;;  %3901 = vmatpush1.bf16.msk.msra.mxu0 %vm4964_vm6, %v4990_v62  ;;  %v4351_v23 = vpop.permute.xlu1 %4350 }
  0x96   : > { %v4353_v25 = vunpack.i.h.bf16 %v4351_v23  ;;  %v4352_v26 = vunpack.i.l.bf16 %v4351_v23  ;;  %v4346_v27 = vpop.permute.xlu0 %4345  ;;  %3573 = vmatprep.subr.msk.mxu0 %vm6335_vm8, %v4994_v63  ;;  %v3902_v29 = vpack.c.bf16 %v712_v11, %v711_v19  ;;  %v3905_v30 = vpack.c.bf16 %v717_v12, %v716_v22 }
  0x97   : > { %v4348_v31 = vunpack.i.h.bf16 %v4346_v27  ;;  %v4347_v32 = vunpack.i.l.bf16 %v4346_v27 }
  0x99   : > { %v714_v39 = vsel %vm6332_vm7, %v4348_v31, %v4353_v25  ;;  %v719_v40 = vsel %vm6332_vm7, %v4353_v25, %v4348_v31  ;;  %v713_v41 = vsel %vm6332_vm7, %v4347_v32, %v4352_v26  ;;  %v718_v38 = vsel %vm6332_vm7, %v4352_v26, %v4347_v32  ;;  %3574 = vmatpush1.msk.msra.mxu0 %vm6335_vm8, %v5035_v36  ;;  %v709_v42 = vpop.permute.xlu1 %708 }
  0x9a   : > { %v3908_v43 = vpack.c.bf16 %v714_v39, %v713_v41  ;;  %v699_v45 = vpop.permute.xlu0 %698  ;;  %3575 = vmatmul.mubr.msk.f32.vlgmr.msra.gmra.mrb[0].mxu0 %vm6336_vm13, %v380_v35  ;;  %3904 = vmatprep.subr.msk.bf16.mxu0 %vm5026_vm12, %v3902_v29  ;;  %v3911_v46 = vpack.c.bf16 %v719_v40, %v718_v38  ;;  %v3581_v35 = vld [vmem:[%s6326_s2 + $0x60] sm:$0xff] }
  0x9b   : > { %v715_v47 = vsel %vm6332_vm7, %v699_v45, %v709_v42  ;;  %3907 = vmatpush1.bf16.msk.msra.mxu0 %vm5040_vm14, %v3905_v30  ;;  %659 = vmatprep.mubr.f32.mxu0 %v4725_v14  ;;  %v720_v52 = vsel %vm6332_vm7, %v709_v42, %v699_v45  ;;  %vm6337_vm7 = vcmp.lt.s32.totalorder %v4913_v20, 16 }
  0x9c   : > { %3910 = vmatprep.subr.msk.bf16.mxu0 %vm5026_vm12, %v3908_v43  ;;  %v734_v53 = vsel %vm4998_vm10, %v715_v47, 0.0  ;;  %v733_v11 = vsel %vm5017_vm11, %v720_v52, 0.0  ;;  %v3582_v52 = vld [vmem:[%s6326_s2 + $0x68] sm:$0xff]  ;;  %vm6338_vm11 = vcmp.lt.s32.totalorder %v4913_v20, 127 }
  0x9d   : > { %v4361_v55 = vpop.permute.xlu1 %4360 }
  0x9e   : > { %v4363_v56 = vunpack.i.h.bf16 %v4361_v55  ;;  %v4362_v57 = vunpack.i.l.bf16 %v4361_v55  ;;  %v4356_v58 = vpop.permute.xlu0 %4355  ;;  %3576 = vmatmul.mubr.msk.f32.gmra.mrb[2].mxu0 %vm6336_vm13, %v381_v51 }
  0x9f   : > { %v4358_v60 = vunpack.i.h.bf16 %v4356_v58  ;;  %v4357_v61 = vunpack.i.l.bf16 %v4356_v58  ;;  %3913 = vmatpush1.bf16.msk.msra.mxu0 %vm5040_vm14, %v3911_v46  ;;  %665 = vmatprep.mubr.f32.mxu0 %v4725_v14  ;;  %v3583_v58 = vld [vmem:[%s6326_s2 + $0x70] sm:$0xff] }
  0xa0   : > { %3595 = vmatprep.subr.msk.mxu0 %vm6335_vm8, %v734_v53 }
  0xa1   : > { %v901_v12 = vsel %vm6331_vm15, %v4358_v60, %v4363_v56  ;;  %v906_v19 = vsel %vm6331_vm15, %v4363_v56, %v4358_v60  ;;  %v900_v22 = vsel %vm6331_vm15, %v4357_v61, %v4362_v57  ;;  %v905_v23 = vsel %vm6331_vm15, %v4362_v57, %v4357_v61  ;;  %v4371_v25 = vpop.permute.xlu1 %4370 }
  0xa2   : > { %v3914_v26 = vpack.c.bf16 %v901_v12, %v900_v22  ;;  %v4373_v27 = vunpack.i.h.bf16 %v4371_v25  ;;  %v4372_v29 = vunpack.i.l.bf16 %v4371_v25  ;;  %v4366_v24 = vpop.permute.xlu0 %4365  ;;  %3577 = vmatmul.mubr.msk.f32.gmra.mrb[4].mxu0 %vm6336_vm13, %v382_v2  ;;  %v3917_v30 = vpack.c.bf16 %v906_v19, %v905_v23  ;;  %v3585_v22 = vld [vmem:[%s6326_s2 + $0x80] sm:$0xff] }
  0xa3   : > { %v4368_v31 = vunpack.i.h.bf16 %v4366_v24  ;;  %v4367_v32 = vunpack.i.l.bf16 %v4366_v24  ;;  %3596 = vmatpush1.msk.msra.mxu0 %vm6335_vm8, %v733_v11  ;;  %830 = vmatprep.mubr.f32.mxu0 %v4725_v14  ;;  %v3584_v11 = vld [vmem:[%s6326_s2 + $0x78] sm:$0xff] }
  0xa4   : > { %3916 = vmatprep.subr.msk.bf16.mxu0 %vm4949_vm5, %v3914_v26  ;;  %v3603_v26 = vld [vmem:[%s6326_s2 + $0x90] sm:$0xff] }
  0xa5   : > { %v903_v40 = vsel %vm6331_vm15, %v4368_v31, %v4373_v27  ;;  %v908_v41 = vsel %vm6331_vm15, %v4373_v27, %v4368_v31  ;;  %v902_v38 = vsel %vm6331_vm15, %v4367_v32, %v4372_v29  ;;  %v907_v42 = vsel %vm6331_vm15, %v4372_v29, %v4367_v32  ;;  %v898_v43 = vpop.permute.xlu1 %897 }
  0xa6   : > { %v3920_v45 = vpack.c.bf16 %v903_v40, %v902_v38  ;;  %v888_v46 = vpop.permute.xlu0 %887  ;;  %3597 = vmatmul.mubr.msk.f32.vlgmr.msra.gmra.mrb[0].mxu0 %vm6336_vm13, %v3581_v35  ;;  %v3923_v47 = vpack.c.bf16 %v908_v41, %v907_v42  ;;  %v3604_v35 = vld [vmem:[%s6326_s2 + $0x98] sm:$0xff]  ;;  %v3607_v42 = vld [vmem:[%s6326_s2 + $0xb0] sm:$0xff] }
  0xa7   : > { %v904_v51 = vsel %vm6331_vm15, %v888_v46, %v898_v43  ;;  %3919 = vmatpush1.bf16.msk.msra.mxu0 %vm5099_vm4, %v3917_v30  ;;  %836 = vmatprep.mubr.f32.mxu0 %v4725_v14  ;;  %v909_v53 = vsel %vm6331_vm15, %v898_v43, %v888_v46  ;;  %vm6334_vm15 = vcmp.lt.s32.totalorder %v4913_v20, 112  ;;  %v4733_v43 = vmov 0  }
  0xa8   : > { %3922 = vmatprep.subr.msk.bf16.mxu0 %vm4949_vm5, %v3920_v45  ;;  %v923_v55 = vsel %vm4926_vm3, %v904_v51, 0.0  ;;  %v922_v60 = vsel %vm4921_vm1, %v909_v53, 0.0  ;;  %4474 = vset.pattern.permute.xlu0 %v4733_v43 }
  0xa9   : > { %v5128_v56 = vpop.permute.xlu1 %4380  ;;  %4475 = vset.pattern.permute.xlu1 %v4733_v43 }
  0xaa   : > { %v5130_v57 = vpop.permute.xlu0 %4375  ;;  %3598 = vmatmul.mubr.msk.f32.gmra.mrb[2].mxu0 %vm6336_vm13, %v3582_v52  ;;  %v4383_v27 = vunpack.i.h.bf16 %v5128_v56  ;;  %v4382_v29 = vunpack.i.l.bf16 %v5128_v56  ;;  %v1969_v56 = vld [vmem:[%s6327_s3 + $0x18] sm:$0xff] }
  0xab   : > { %842 = vmatprep.mubr.f32.mxu0 %v4725_v14  ;;  %3925 = vmatpush1.bf16.msk.msra.mxu0 %vm5099_vm4, %v3923_v47  ;;  %v4378_v24 = vunpack.i.h.bf16 %v5130_v57  ;;  %v4377_v30 = vunpack.i.l.bf16 %v5130_v57 }
  0xac   : > { %3617 = vmatprep.subr.msk.mxu0 %vm6335_vm8, %v923_v55 }
  0xad   : > { %v5142_v61 = vpop.permute.xlu1 %4390  ;;  %v1237_v40 = vsel %vm6338_vm11, %v4383_v27, %v4378_v24  ;;  %v1236_v41 = vsel %vm6338_vm11, %v4382_v29, %v4377_v30  ;;  %v5261_v52 = vsel %vm6338_vm11, %v4378_v24, %v4383_v27  ;;  %v1231_v53 = vsel %vm6338_vm11, %v4377_v30, %v4382_v29 }
  0xae   : > { %v5144_v2 = vpop.permute.xlu0 %4385  ;;  %3599 = vmatmul.mubr.msk.f32.gmra.mrb[4].mxu0 %vm6336_vm13, %v3583_v58  ;;  %v3934_v5 = vpack.c.bf16 %v1237_v40, %v1236_v41  ;;  %v4393_v45 = vunpack.i.h.bf16 %v5142_v61  ;;  %v4392_v46 = vunpack.i.l.bf16 %v5142_v61  ;;  %v1968_v61 = vld [vmem:[%s6327_s3 + $0x10] sm:$0xff]  ;;  %v1971_v41 = vld [vmem:[%s6327_s3 + $0x28] sm:$0xff] }
  0xaf   : > { %848 = vmatprep.mubr.f32.mxu0 %v4725_v14  ;;  %3618 = vmatpush1.msk.msra.mxu0 %vm6335_vm8, %v922_v60  ;;  %v4388_v47 = vunpack.i.h.bf16 %v5144_v2  ;;  %v4387_v51 = vunpack.i.l.bf16 %v5144_v2 }
  0xb0   : > { %3927 = vmatprep.subr.bf16.mxu0 %v3926_v15 }
  0xb1   : > { %v5155_v12 = vpop.permute.xlu1 %1228  ;;  %v1238_v27 = vsel %vm6338_vm11, %v4392_v46, %v4387_v51  ;;  %v1234_v43 = vsel %vm6338_vm11, %v4388_v47, %v4393_v45 }
  0xb2   : > { %v5157_v19 = vpop.permute.xlu0 %1218  ;;  %3600 = vmatmul.mubr.msk.f32.gmra.mrb[6].mxu0 %vm6336_vm13, %v3584_v11 }
  0xb3   : > { %854 = vmatprep.mubr.f32.mxu0 %v4725_v14 }
  0xb5   : > { %v5164_v23 = vpop.permute.xlu1 %4400 }
  0xb6   : > { %v5166_v25 = vpop.permute.xlu0 %4395  ;;  %3601 = vmatmul.mubr.msk.f32.gmra.mrb[8].mxu0 %vm6336_vm13, %v3585_v22  ;;  %v3608_v22 = vld [vmem:[%s6326_s2 + $0xb8] sm:$0xff] }
  0xb7   : > { %860 = vmatprep.mubr.f32.mxu0 %v4725_v14 }
  0xb9   : > { %v5173_v9 = vpop.permute.xlu1 %4410 }
  0xba   : > { %v5175_v15 = vpop.permute.xlu0 %4405  ;;  %3602 = vmatmul.mubr.msk.f32.gmra.mrb[10].mxu0 %vm6336_vm13, %v3586_v8  ;;  %v3937_v8 = vpack.c.bf16 %v5261_v52, %v1231_v53  ;;  %v1233_v52 = vsel %vm6338_vm11, %v4387_v51, %v4392_v46  ;;  %v4403_v51 = vunpack.i.h.bf16 %v5164_v23 }
  0xbb   : > { %1019 = vmatprep.mubr.f32.mxu0 %v4725_v14 }
  0xbd   : > { %v5186_v31 = vpop.permute.xlu1 %1417 }
  0xbe   : > { %v5189_v32 = vpop.permute.xlu0 %1407  ;;  %3619 = vmatmul.mubr.msk.f32.vlgmr.msra.gmra.mrb[0].mxu0 %vm6336_vm13, %v3603_v26  ;;  %v1239_v26 = vsel %vm6338_vm11, %v4393_v45, %v4388_v47  ;;  %v1240_v47 = vsel %vm6338_vm11, %v5155_v12, %v5157_v19  ;;  %v3856_v45 = vld [vmem:[%s6328_s4 + $0x108] sm:$0xff] }
  0xbf   : > { %3929 = vmatpush1.bf16.msra.mxu0 %v3928_v16  ;;  %1025 = vmatprep.mubr.f32.mxu0 %v4725_v14  ;;  %v3940_v46 = vpack.c.bf16 %v1239_v26, %v1238_v27  ;;  %v4398_v26 = vunpack.i.h.bf16 %v5166_v25  ;;  %v4397_v27 = vunpack.i.l.bf16 %v5166_v25 }
  0xc0   : > { %3931 = vmatprep.subr.bf16.mxu0 %v3930_v17  ;;  %v3606_v17 = vld [vmem:[%s6326_s2 + $0xa8] sm:$0xff] }
  0xc1   : > { %v5206_v38 = vpop.permute.xlu1 %4420 }
  0xc2   : > { %v5208_v3 = vpop.permute.xlu0 %4415  ;;  %3620 = vmatmul.mubr.msk.f32.gmra.mrb[2].mxu0 %vm6336_vm13, %v3604_v35 }
  0xc3   : > { %1031 = vmatprep.mubr.f32.mxu0 %v4725_v14  ;;  %3933 = vmatpush1.bf16.msra.mxu0 %v3932_v18  ;;  %v1967_v18 = vld [vmem:[%s6327_s3 + $0x8] sm:$0xff] }
  0xc4   : > { %3631 = vmatprep.subr.msk.mxu0 %vm6335_vm8, %v4825_v13  ;;  %v1966_v13 = vld [vmem:[%s6327_s3] sm:$0xff]  ;;  %1979 = vperm.xlu1 %4475, %v1967_v18  }
  0xc5   : > { %v5220_v7 = vpop.permute.xlu1 %4430  ;;  %1974 = vperm.xlu0 %4474, %v1966_v13  }
  0xc6   : > { %v5222_v16 = vpop.permute.xlu0 %4425  ;;  %3621 = vmatmul.mubr.msk.f32.gmra.mrb[4].mxu0 %vm6336_vm13, %v3605_v4 }
  0xc7   : > { %1037 = vmatprep.mubr.f32.mxu0 %v4725_v14  ;;  %3632 = vmatpush1.msk.msra.mxu0 %vm6335_vm8, %v4813_v10  ;;  %vm6341_vm8 = vcmp.lt.s32.totalorder %v4913_v20, 113 }
  0xc8   : > { %3936 = vmatprep.subr.msk.bf16.mxu0 %vm5026_vm12, %v3934_v5  ;;  %1984 = vperm.xlu1 %4475, %v1968_v61  }
  0xc9   : > { %v5233_v0 = vpop.permute.xlu1 %1606  ;;  %1989 = vperm.xlu0 %4474, %v1969_v56   ;;  %v3625_v56 = vld [vmem:[%s6326_s2 + $0xc0] sm:$0xff] }
  0xca   : > { %v5236_v1 = vpop.permute.xlu0 %1596  ;;  %3622 = vmatmul.mubr.msk.f32.gmra.mrb[6].mxu0 %vm6336_vm13, %v3606_v17 }
  0xcb   : > { %v5249_v10 = vsel %vm6334_vm15, %v5236_v1, %v5233_v0  ;;  %1043 = vmatprep.mubr.f32.mxu0 %v4725_v14  ;;  %vm5315_vm15 = vmpackc.low %vm4986_vm9, %vm4986_vm9 }
  0xcd   : > { %v4441_v55 = vpop.permute.xlu1 %4440  ;;  %1999 = vperm.xlu0 %4474, %v1971_v41  }
  0xce   : > { %v4443_v57 = vunpack.i.h.bf16 %v4441_v55  ;;  %v4442_v58 = vunpack.i.l.bf16 %v4441_v55  ;;  %v4436_v60 = vpop.permute.xlu0 %4435  ;;  %3623 = vmatmul.mubr.msk.f32.gmra.mrb[8].mxu0 %vm6336_vm13, %v3607_v42 }
  0xcf   : > { %v4438_v2 = vunpack.i.h.bf16 %v4436_v60  ;;  %v4437_v11 = vunpack.i.l.bf16 %v4436_v60  ;;  %1049 = vmatprep.mubr.f32.mxu0 %v4725_v14 }
  0xd1   : > { %v4451_v29 = vpop.permute.xlu1 %4450  ;;  %v407_v24 = vsel %vm6337_vm7, %v4437_v11, %v4442_v58  ;;  %v408_v30 = vsel %vm6337_vm7, %v4438_v2, %v4443_v57  ;;  %v412_v35 = vsel %vm6337_vm7, %v4442_v58, %v4437_v11  ;;  %v413_v40 = vsel %vm6337_vm7, %v4443_v57, %v4438_v2  ;;  %v1970_v57 = vld [vmem:[%s6327_s3 + $0x20] sm:$0xff] }
  0xd2   : > { %v4453_v4 = vunpack.i.h.bf16 %v4451_v29  ;;  %v4452_v5 = vunpack.i.l.bf16 %v4451_v29  ;;  %v4446_v17 = vpop.permute.xlu0 %4445  ;;  %3624 = vmatmul.mubr.msk.f32.gmra.mrb[10].mxu0 %vm6336_vm13, %v3608_v22  ;;  %v3880_v13 = vpack.c.bf16 %v408_v30, %v407_v24  ;;  %v3882_v18 = vpack.c.bf16 %v413_v40, %v412_v35  ;;  %1994 = vperm.xlu1 %4475, %v1970_v57  }
  0xd3   : > { %v4448_v53 = vunpack.i.h.bf16 %v4446_v17  ;;  %v4447_v55 = vunpack.i.l.bf16 %v4446_v17  ;;  %1161 = vmatprep.mubr.f32.mxu0 %v4725_v14  ;;  %v4402_v58 = vunpack.i.l.bf16 %v5164_v23  ;;  %v3943_v35 = vpack.c.bf16 %v1234_v43, %v1233_v52  ;;  %v3547_v43 = vld [vmem:[%s6326_s2 + $0x30] sm:$0xff] }
  0xd4   : > { %3881 = vmatprep.subr.bf16.mxu1 %v3880_v13  ;;  %v1426_v17 = vsel %vm6341_vm8, %v4403_v51, %v4398_v26  ;;  %v4412_v57 = vunpack.i.l.bf16 %v5173_v9 }
  0xd5   : > { %v415_v60 = vsel %vm6337_vm7, %v4453_v4, %v4448_v53  ;;  %v414_v61 = vsel %vm6337_vm7, %v4452_v5, %v4447_v55  ;;  %3884 = vmatpush1.bf16.msk.msra.mxu1 %vm5297_vm2, %v3882_v18  ;;  %v409_v2 = vsel %vm6337_vm7, %v4447_v55, %v4452_v5  ;;  %v410_v11 = vsel %vm6337_vm7, %v4448_v53, %v4453_v4  ;;  %v405_v22 = vpop.permute.xlu1 %404  ;;  %v3626_v4 = vld [vmem:[%s6326_s2 + $0xc8] sm:$0xff]  ;;  %v3628_v55 = vld [vmem:[%s6326_s2 + $0xd8] sm:$0xff] }
  0xd6   : > { %v3887_v29 = vpack.c.bf16 %v415_v60, %v414_v61  ;;  %3633 = vmatmul.mubr.msk.f32.vlgmr.msra.gmra.mrb[0].mxu0 %vm6336_vm13, %v3625_v56  ;;  %v3885_v24 = vpack.c.bf16 %v410_v11, %v409_v2  ;;  %v395_v30 = vpop.permute.xlu0 %394  ;;  %vm6342_vm13 = vcmp.lt.s32.totalorder %v4916_v21, 240  ;;  %v1235_v5 = vsel %vm6338_vm11, %v5157_v19, %v5155_v12  ;;  %v3627_v19 = vld [vmem:[%s6326_s2 + $0xd0] sm:$0xff]  ;;  %v3804_v53 = vld [vmem:[%s6328_s4 + $0xb8] sm:$0xff] }
  0xd7   : > { %3939 = vmatpush1.bf16.msk.msra.mxu0 %vm5315_vm15, %v3937_v8  ;;  %1167 = vmatprep.mubr.f32.mxu0 %v4725_v14  ;;  %v411_v40 = vsel %vm6337_vm7, %v395_v30, %v405_v22  ;;  %v416_v41 = vsel %vm6337_vm7, %v405_v22, %v395_v30  ;;  %v1254_v8 = vsel %vm4998_vm10, %v1240_v47, 0.0  ;;  %v1425_v13 = vsel %vm6341_vm8, %v4402_v58, %v4397_v27  ;;  %vm5380_vm14 = vmand %vm6342_vm13, %vm4926_vm3 }
  0xd8   : > { %3886 = vmatprep.subr.bf16.mxu1 %v3885_v24  ;;  %3942 = vmatprep.subr.msk.bf16.mxu0 %vm5026_vm12, %v3940_v46  ;;  %v429_v18 = vsel %vm319_vm0, %v416_v41, 0.0  ;;  %vm6369_vm7 = vcmask 277504   ;;  %vm6370_vm11 = vcmask 1041408   ;;  %v1253_v33 = vsel %vm4986_vm9, %v1235_v5, 0.0  ;;  %v3552_v41 = vld [vmem:[%s6326_s2 + $0x58] sm:$0xff] }
  0xd9   : > { %3889 = vmatpush1.bf16.msk.msra.mxu1 %vm5297_vm2, %v3887_v29  ;;  %vm6373_vm0 = vmmov %vm6370_vm11  ;;  %v3946_v52 = vpack.c.bf16 %v1426_v17, %v1425_v13  ;;  %v4413_v56 = vunpack.i.h.bf16 %v5173_v9  ;;  %v4408_v46 = vunpack.i.h.bf16 %v5175_v15  ;;  %v4407_v47 = vunpack.i.l.bf16 %v5175_v15  ;;  %v3550_v15 = vld [vmem:[%s6326_s2 + $0x48] sm:$0xff]  ;;  %v383_v5 = vld [vmem:[%s6326_s2 + $0x18] sm:$0xff] }
  0xda   : > { %3634 = vmatmul.mubr.msk.f32.gmra.mrb[2].mxu0 %vm6369_vm7, %v3626_v4  ;;  %3557 = vmatprep.subr.msk.mxu1 %vm6370_vm11, %v411_v40  ;;  %vm6374_vm3 = vmmov %vm6373_vm0  ;;  %vm6377_vm11 = vcmask 277504   ;;  %v1421_v9 = vsel %vm6341_vm8, %v4398_v26, %v4403_v51  ;;  %v4423_v2 = vunpack.i.h.bf16 %v5206_v38  ;;  %v4422_v11 = vunpack.i.l.bf16 %v5206_v38  ;;  %v3640_v38 = vld [vmem:[%s6326_s2 + $0xf8] sm:$0xff]  ;;  %v384_v17 = vld [vmem:[%s6326_s2 + $0x20] sm:$0xff] }
  0xdb   : > { %1173 = vmatprep.mubr.f32.mxu0 %v4725_v14  ;;  %3945 = vmatpush1.bf16.msk.msra.mxu0 %vm5315_vm15, %v3943_v35  ;;  %vm5400_vm7 = vmpackc.low %vm5380_vm14, %vm5380_vm14  ;;  %v1428_v60 = vsel %vm6341_vm8, %v4413_v56, %v4408_v46  ;;  %v1427_v23 = vsel %vm6341_vm8, %v4412_v57, %v4407_v47  ;;  %v1423_v51 = vsel %vm6341_vm8, %v4408_v46, %v4413_v56  ;;  %v4418_v22 = vunpack.i.h.bf16 %v5208_v3  ;;  %v3643_v13 = vld [vmem:[%s6326_s2 + $0x110] sm:$0xff] }
  0xdc   : > { %3653 = vmatprep.subr.msk.mxu0 %vm6373_vm0, %v1254_v8  ;;  %vm6378_vm0 = vmmov %vm6377_vm11  ;;  %v3952_v61 = vpack.c.bf16 %v1428_v60, %v1427_v23  ;;  %v4417_v26 = vunpack.i.l.bf16 %v5208_v3  ;;  %v1429_v29 = vsel %vm6341_vm8, %v5186_v31, %v5189_v32  ;;  %v1424_v3 = vsel %vm6341_vm8, %v5189_v32, %v5186_v31  ;;  %v3641_v31 = vld [vmem:[%s6326_s2 + $0x100] sm:$0xff] }
  0xdd   : > { %3558 = vmatpush1.msk.msra.mxu1 %vm6374_vm3, %v429_v18  ;;  %v1443_v30 = vsel %vm5380_vm14, %v1429_v29, 0.0  ;;  %v1442_v32 = vsel %vm4921_vm1, %v1424_v3, 0.0  ;;  %vm6386_vm14 = vcmask 1041408   ;;  %v4433_v18 = vunpack.i.h.bf16 %v5220_v7 }
  0xde   : > { %4130 = vmatprep.subr.msk.bf16.mxu1 %vm4949_vm5, %v4957_v48  ;;  %3635 = vmatmul.mubr.msk.f32.gmra.mrb[4].mxu0 %vm6377_vm11, %v3627_v19  ;;  %v3548_v48 = vld [vmem:[%s6326_s2 + $0x38] sm:$0xff]  ;;  %vm6379_vm11 = vmmov %vm6378_vm0  ;;  %v4432_v12 = vunpack.i.l.bf16 %v5220_v7  ;;  %v4428_v19 = vunpack.i.h.bf16 %v5222_v16 }
  0xdf   : > { %3559 = vmatmul.mubr.msk.f32.vlgmr.msra.gmra.mrb[0].mxu1 %vm6378_vm0, %v3547_v43  ;;  %1179 = vmatprep.mubr.f32.mxu0 %v4725_v14  ;;  %vm6391_vm1 = vmmov %vm6386_vm14  ;;  %v4427_v43 = vunpack.i.l.bf16 %v5222_v16 }
  0xe0   : > { %4133 = vmatpush1.bf16.msk.msra.mxu1 %vm4964_vm6, %v4959_v49  ;;  %3654 = vmatpush1.msk.msra.mxu0 %vm6374_vm3, %v1253_v33  ;;  %v3629_v49 = vld [vmem:[%s6326_s2 + $0xe0] sm:$0xff]  ;;  %v385_v33 = vld [vmem:[%s6326_s2 + $0x28] sm:$0xff] }
  0xe1   : > { %4131 = vmatprep.subr.msk.bf16.mxu1 %vm4949_vm5, %v4977_v54  ;;  %3948 = vmatprep.subr.msk.bf16.mxu0 %vm5400_vm7, %v3946_v52  ;;  %v3549_v54 = vld [vmem:[%s6326_s2 + $0x40] sm:$0xff]  ;;  %v3644_v52 = vld [vmem:[%s6326_s2 + $0x118] sm:$0xff] }
  0xe2   : > { %3636 = vmatmul.mubr.msk.f32.gmra.mrb[6].mxu0 %vm6379_vm11, %v3628_v55  ;;  %534 = vmatprep.mubr.f32.mxu1 %v4725_v14  ;;  %vm6380_vm11 = vmmov %vm6378_vm0 }
  0xe3   : > { %1185 = vmatprep.mubr.f32.mxu0 %v4725_v14  ;;  %3560 = vmatmul.mubr.msk.f32.gmra.mrb[2].mxu1 %vm6378_vm0, %v3548_v48 }
  0xe4   : > { %4134 = vmatpush1.bf16.msk.msra.mxu1 %vm4964_vm6, %v4990_v62  ;;  %540 = vmatprep.mubr.f32.mxu1 %v4725_v14  ;;  %v3630_v62 = vld [vmem:[%s6326_s2 + $0xe8] sm:$0xff] }
  0xe5   : > { %4132 = vmatprep.subr.msk.mxu1 %vm6374_vm3, %v4994_v63  ;;  %v1420_v63 = vsel %vm6341_vm8, %v4397_v27, %v4402_v58  ;;  %v1422_v58 = vsel %vm6341_vm8, %v4407_v47, %v4412_v57  ;;  %v3551_v27 = vld [vmem:[%s6326_s2 + $0x50] sm:$0xff]  ;;  %v3661_v57 = vld [vmem:[%s6326_s2 + $0x120] sm:$0xff] }
  0xe6   : > { %3637 = vmatmul.mubr.msk.f32.gmra.mrb[8].mxu0 %vm6380_vm11, %v3629_v49  ;;  %vm6381_vm11 = vmmov %vm6378_vm0  ;;  %v3949_v25 = vpack.c.bf16 %v1421_v9, %v1420_v63  ;;  %v3955_v24 = vpack.c.bf16 %v1423_v51, %v1422_v58  ;;  %v4461_v49 = vpop.permute.xlu1 %4460 }
  0xe7   : > { %1191 = vmatprep.mubr.f32.mxu0 %v4725_v14  ;;  %3561 = vmatmul.mubr.msk.f32.gmra.mrb[4].mxu1 %vm6378_vm0, %v3549_v54  ;;  %v4456_v54 = vpop.permute.xlu0 %4455  ;;  %v4463_v9 = vunpack.i.h.bf16 %v4461_v49  ;;  %v4462_v63 = vunpack.i.l.bf16 %v4461_v49  ;;  %v3703_v49 = vld [vmem:[%s6326_s2 + $0x190] sm:$0xff] }
  0xe8   : > { %4135 = vmatpush1.msk.msra.mxu1 %vm6374_vm3, %v5035_v36  ;;  %546 = vmatprep.mubr.f32.mxu1 %v4725_v14  ;;  %v3639_v36 = vld [vmem:[%s6326_s2 + $0xf0] sm:$0xff]  ;;  %vm6382_vm3 = vmmov %vm6378_vm0  ;;  %v4457_v60 = vunpack.i.l.bf16 %v4456_v54 }
  0xea   : > { %3638 = vmatmul.mubr.msk.f32.gmra.mrb[10].mxu0 %vm6381_vm11, %v3630_v62  ;;  %vm6383_vm11 = vmmov %vm6378_vm0 }
  0xeb   : > { %1350 = vmatprep.mubr.f32.mxu0 %v4725_v14  ;;  %3562 = vmatmul.mubr.msk.f32.gmra.mrb[6].mxu1 %vm6378_vm0, %v3550_v15  ;;  %vm6384_vm0 = vcmp.lt.s32.totalorder %v4913_v20, 112  ;;  %v4458_v15 = vunpack.i.h.bf16 %v4456_v54  ;;  %v3704_v54 = vld [vmem:[%s6326_s2 + $0x198] sm:$0xff] }
  0xec   : > { %552 = vmatprep.mubr.f32.mxu1 %v4725_v14  ;;  %v1615_v35 = vsel %vm6384_vm0, %v4423_v2, %v4418_v22 }
  0xee   : > { %3655 = vmatmul.mubr.msk.f32.vlgmr.msra.gmra.mrb[0].mxu0 %vm6382_vm3, %v3639_v36  ;;  %vm6385_vm3 = vmmov %vm6384_vm0  ;;  %v3662_v36 = vld [vmem:[%s6326_s2 + $0x128] sm:$0xff] }
  0xef   : > { %3951 = vmatpush1.bf16.msk.msra.mxu0 %vm5099_vm4, %v3949_v25  ;;  %1356 = vmatprep.mubr.f32.mxu0 %v4725_v14  ;;  %v1614_v40 = vsel %vm6385_vm3, %v4422_v11, %v4417_v26  ;;  %vm6387_vm0 = vmmov %vm6383_vm11 }
  0xf0   : > { %3954 = vmatprep.subr.msk.bf16.mxu0 %vm5400_vm7, %v3952_v61  ;;  %3563 = vmatmul.mubr.msk.f32.gmra.mrb[8].mxu1 %vm6383_vm11, %v3551_v27  ;;  %v3958_v4 = vpack.c.bf16 %v1615_v35, %v1614_v40  ;;  %vm5533_vm3 = vmpackc.low %vm6342_vm13, %vm6342_vm13  ;;  %v3663_v61 = vld [vmem:[%s6326_s2 + $0x130] sm:$0xff] }
  0xf1   : > { %558 = vmatprep.mubr.f32.mxu1 %v4725_v14 }
  0xf2   : > { %3656 = vmatmul.mubr.msk.f32.gmra.mrb[2].mxu0 %vm6383_vm11, %v3640_v38  ;;  %vm6390_vm11 = vmmov %vm6387_vm0  ;;  %v3666_v38 = vld [vmem:[%s6326_s2 + $0x148] sm:$0xff] }
  0xf3   : > { %1362 = vmatprep.mubr.f32.mxu0 %v4725_v14  ;;  %3957 = vmatpush1.bf16.msk.msra.mxu0 %vm5099_vm4, %v3955_v24 }
  0xf4   : > { %3675 = vmatprep.subr.msk.mxu0 %vm6386_vm14, %v1443_v30  ;;  %3564 = vmatmul.mubr.msk.f32.gmra.mrb[10].mxu1 %vm6387_vm0, %v3552_v41  ;;  %vm6392_vm14 = vmmov %vm6387_vm0 }
  0xf5   : > { %671 = vmatprep.mubr.f32.mxu1 %v4725_v14 }
  0xf6   : > { %3657 = vmatmul.mubr.msk.f32.gmra.mrb[4].mxu0 %vm6390_vm11, %v3641_v31  ;;  %vm6393_vm11 = vmmov %vm6387_vm0  ;;  %v3683_v31 = vld [vmem:[%s6326_s2 + $0x150] sm:$0xff] }
  0xf7   : > { %1368 = vmatprep.mubr.f32.mxu0 %v4725_v14  ;;  %3676 = vmatpush1.msk.msra.mxu0 %vm6391_vm1, %v1442_v32  ;;  %vm6394_vm1 = vmmov %vm6387_vm0 }
  0xf8   : > { %3960 = vmatprep.subr.msk.bf16.mxu0 %vm5533_vm3, %v3958_v4  ;;  %3578 = vmatmul.mubr.msk.f32.vlgmr.msra.gmra.mrb[6].mxu1 %vm6392_vm14, %v383_v5  ;;  %vm6395_vm14 = vcmp.lt.s32.totalorder %v4913_v20, 112 }
  0xf9   : > { %677 = vmatprep.mubr.f32.mxu1 %v4725_v14  ;;  %v1610_v7 = vsel %vm6395_vm14, %v4418_v22, %v4423_v2  ;;  %v4466_v22 = vpop.permute.xlu0 %4465 }
  0xfa   : > { %3658 = vmatmul.mubr.msk.f32.gmra.mrb[6].mxu0 %vm6387_vm0, %v3642_v28  ;;  %vm6396_vm0 = vmmov %vm6395_vm14  ;;  %v4468_v29 = vunpack.i.h.bf16 %v4466_v22  ;;  %v4467_v24 = vunpack.i.l.bf16 %v4466_v22 }
  0xfb   : > { %1374 = vmatprep.mubr.f32.mxu0 %v4725_v14  ;;  %v1609_v16 = vsel %vm6396_vm0, %v4417_v26, %v4422_v11  ;;  %vm6398_vm8 = vmmov %vm6396_vm0  ;;  %v4471_v11 = vpop.permute.xlu1 %4470  ;;  %v3665_v26 = vld [vmem:[%s6326_s2 + $0x140] sm:$0xff] }
  0xfc   : > { %3579 = vmatmul.mubr.msk.f32.gmra.mrb[8].mxu1 %vm6393_vm11, %v384_v17  ;;  %vm6397_vm11 = vmmov %vm6394_vm1  ;;  %v1617_v55 = vsel %vm6398_vm8, %v4433_v18, %v4428_v19  ;;  %v3961_v56 = vpack.c.bf16 %v1610_v7, %v1609_v16  ;;  %v4472_v27 = vunpack.i.l.bf16 %v4471_v11  ;;  %v3686_v7 = vld [vmem:[%s6326_s2 + $0x168] sm:$0xff]  ;;  %v3688_v16 = vld [vmem:[%s6326_s2 + $0x178] sm:$0xff] }
  0xfd   : > { %683 = vmatprep.mubr.f32.mxu1 %v4725_v14  ;;  %vm6399_vm13 = vmmov %vm6396_vm0  ;;  %v1786_v4 = vpop.permute.xlu0 %1785 }
  0xfe   : > { %3659 = vmatmul.mubr.msk.f32.gmra.mrb[8].mxu0 %vm6394_vm1, %v3643_v13  ;;  %v1616_v48 = vsel %vm6399_vm13, %v4432_v12, %v4427_v43  ;;  %vm6400_vm14 = vmmov %vm6396_vm0 }
  0xff   : > { %1380 = vmatprep.mubr.f32.mxu0 %v4725_v14  ;;  %v1612_v46 = vsel %vm6400_vm14, %v4428_v19, %v4433_v18  ;;  %vm6401_vm8 = vmmov %vm6396_vm0  ;;  %v3963_v62 = vpack.c.bf16 %v1617_v55, %v1616_v48  ;;  %v1796_v32 = vpop.permute.xlu1 %1795  ;;  %v3701_v55 = vld [vmem:[%s6326_s2 + $0x180] sm:$0xff]  ;;  %v3702_v48 = vld [vmem:[%s6326_s2 + $0x188] sm:$0xff] }
 0x100   : > { %3580 = vmatmul.mubr.msk.f32.gmra.mrb[10].mxu1 %vm6397_vm11, %v385_v33  ;;  %v1611_v47 = vsel %vm6401_vm8, %v4427_v43, %v4432_v12  ;;  %vm6402_vm13 = vmmov %vm6396_vm0  ;;  %vm1797_vm11 = vcmp.lt.s32.totalorder %v4913_v20, 111  ;;  %v3684_v12 = vld [vmem:[%s6326_s2 + $0x158] sm:$0xff]  ;;  %v3685_v33 = vld [vmem:[%s6326_s2 + $0x160] sm:$0xff] }
 0x101   : > { %2208 = vmatprep.mubr.f32.mxu1 %v4725_v14  ;;  %v1618_v23 = vsel %vm6402_vm13, %v5233_v0, %v5236_v1  ;;  %vm6403_vm0 = vmmov %vm6394_vm1  ;;  %v3966_v25 = vpack.c.bf16 %v1612_v46, %v1611_v47  ;;  %v1804_v0 = vsel %vm1797_vm11, %v4463_v9, %v4458_v15  ;;  %v1803_v1 = vsel %vm1797_vm11, %v4462_v63, %v4457_v60 }
 0x102   : > { %3660 = vmatmul.mubr.msk.f32.gmra.mrb[10].mxu0 %vm6394_vm1, %v3644_v52  ;;  %vm6404_vm1 = vcmp.lt.s32.totalorder %v4916_v21, 240  ;;  %vm6405_vm14 = vmmov %vm6403_vm0  ;;  %v3968_v2 = vpack.c.bf16 %v1804_v0, %v1803_v1  ;;  %v3664_v21 = vld [vmem:[%s6326_s2 + $0x138] sm:$0xff]  ;;  %v1799_v3 = vsel %vm1797_vm11, %v4458_v15, %v4463_v9  ;;  %v1798_v30 = vsel %vm1797_vm11, %v4457_v60, %v4462_v63 }
 0x103   : > { %1539 = vmatprep.mubr.f32.mxu0 %v4725_v14  ;;  %v1632_v51 = vsel %vm6404_vm1, %v1618_v23, 0.0  ;;  %vm6406_vm8 = vmmov %vm6404_vm1  ;;  %v1805_v40 = vsel %vm1797_vm11, %v4472_v27, %v4467_v24  ;;  %v3971_v41 = vpack.c.bf16 %v1799_v3, %v1798_v30  ;;  %v1800_v28 = vsel %vm1797_vm11, %v4467_v24, %v4472_v27 }
 0x104   : > { %vm5615_vm13 = vmand %vm6406_vm8, %vm4998_vm10  ;;  %v1807_v13 = vsel %vm1797_vm11, %v1796_v32, %v1786_v4  ;;  %v1802_v19 = vsel %vm1797_vm11, %v1786_v4, %v1796_v32 }
 0x105   : > { %vm5627_vm1 = vmpackc.low %vm5615_vm13, %vm5615_vm13  ;;  %v1821_v43 = vsel %vm5615_vm13, %v1807_v13, 0.0  ;;  %v1820_v52 = vsel %vm4986_vm9, %v1802_v19, 0.0 }
 0x106   : > { %3677 = vmatmul.mubr.msk.f32.vlgmr.msra.gmra.mrb[0].mxu0 %vm6403_vm0, %v3661_v57  ;;  %vm6409_vm0 = vcmask 1041408   ;;  %vm6412_vm10 = vmmov %vm6405_vm14  ;;  %v3706_v57 = vld [vmem:[%s6326_s2 + $0x1a8] sm:$0xff] }
 0x107   : > { %3962 = vmatpush1.bf16.msra.mxu0 %v3961_v56  ;;  %1545 = vmatprep.mubr.f32.mxu0 %v4725_v14  ;;  %vm6414_vm8 = vmmov %vm6412_vm10  ;;  %v3705_v56 = vld [vmem:[%s6326_s2 + $0x1a0] sm:$0xff] }
 0x108   : > { %3965 = vmatprep.subr.msk.bf16.mxu0 %vm5533_vm3, %v3963_v62 }
 0x10a   : > { %3678 = vmatmul.mubr.msk.f32.gmra.mrb[2].mxu0 %vm6405_vm14, %v3662_v36  ;;  %vm6413_vm14 = vmmov %vm6409_vm0 }
 0x10b   : > { %3967 = vmatpush1.bf16.msra.mxu0 %v3966_v25  ;;  %1551 = vmatprep.mubr.f32.mxu0 %v4725_v14 }
 0x10c   : > { %3693 = vmatprep.subr.msk.mxu0 %vm6409_vm0, %v1632_v51  ;;  %vm6415_vm0 = vmmov %vm6414_vm8 }
 0x10e   : > { %3679 = vmatmul.mubr.msk.f32.gmra.mrb[4].mxu0 %vm6412_vm10, %v3663_v61  ;;  %vm6416_vm10 = vmmov %vm6415_vm0 }
 0x10f   : > { %3694 = vmatpush1.msk.msra.mxu0 %vm6413_vm14, %v5249_v10  ;;  %1557 = vmatprep.mubr.f32.mxu0 %v4725_v14  ;;  %v4473_v10 = vunpack.i.h.bf16 %v4471_v11  ;;  %vm6417_vm14 = vmmov %vm6415_vm0 }
 0x110   : > { %3970 = vmatprep.subr.msk.bf16.mxu0 %vm5627_vm1, %v3968_v2 }
 0x111   : > { %v1806_v35 = vsel %vm1797_vm11, %v4473_v10, %v4468_v29  ;;  %v1801_v5 = vsel %vm1797_vm11, %v4468_v29, %v4473_v10 }
 0x112   : > { %3680 = vmatmul.mubr.msk.f32.gmra.mrb[6].mxu0 %vm6414_vm8, %v3664_v21  ;;  %v3974_v17 = vpack.c.bf16 %v1806_v35, %v1805_v40  ;;  %v3977_v18 = vpack.c.bf16 %v1801_v5, %v1800_v28  ;;  %vm6418_vm8 = vmmov %vm6415_vm0 }
 0x113   : > { %1563 = vmatprep.mubr.f32.mxu0 %v4725_v14  ;;  %vm6423_vm9 = vmmov %vm6418_vm8 }
 0x116   : > { %3681 = vmatmul.mubr.msk.f32.gmra.mrb[8].mxu0 %vm6415_vm0, %v3665_v26  ;;  %vm6419_vm0 = vcmask 1041408  }
 0x117   : > { %1569 = vmatprep.mubr.f32.mxu0 %v4725_v14  ;;  %vm6421_vm13 = vmmov %vm6419_vm0 }
 0x11a   : > { %3682 = vmatmul.mubr.msk.f32.gmra.mrb[10].mxu0 %vm6416_vm10, %v3666_v38  ;;  %vm6420_vm10 = vmmov %vm6418_vm8 }
 0x11b   : > { %1728 = vmatprep.mubr.f32.mxu0 %v4725_v14 }
 0x11e   : > { %3695 = vmatmul.mubr.msk.f32.vlgmr.msra.gmra.mrb[0].mxu0 %vm6417_vm14, %v3683_v31  ;;  %vm6422_vm14 = vmmov %vm6418_vm8 }
 0x11f   : > { %3973 = vmatpush1.bf16.msk.msra.mxu0 %vm5315_vm15, %v3971_v41  ;;  %1734 = vmatprep.mubr.f32.mxu0 %v4725_v14 }
 0x120   : > { %3976 = vmatprep.subr.msk.bf16.mxu0 %vm5627_vm1, %v3974_v17 }
 0x122   : > { %3696 = vmatmul.mubr.msk.f32.gmra.mrb[2].mxu0 %vm6418_vm8, %v3684_v12 }
 0x123   : > { %1740 = vmatprep.mubr.f32.mxu0 %v4725_v14  ;;  %3979 = vmatpush1.bf16.msk.msra.mxu0 %vm5315_vm15, %v3977_v18 }
 0x124   : > { %3715 = vmatprep.subr.msk.mxu0 %vm6419_vm0, %v1821_v43  ;;  %vm6424_vm0 = vmmov %vm6418_vm8 }
 0x126   : > { %3697 = vmatmul.mubr.msk.f32.gmra.mrb[4].mxu0 %vm6420_vm10, %v3685_v33  ;;  %vm6425_vm10 = vmmov %vm6424_vm0 }
 0x127   : > { %1746 = vmatprep.mubr.f32.mxu0 %v4725_v14  ;;  %3716 = vmatpush1.msk.msra.mxu0 %vm6421_vm13, %v1820_v52  ;;  %vm6426_vm13 = vmmov %vm6424_vm0 }
 0x12a   : > { %3698 = vmatmul.mubr.msk.f32.gmra.mrb[6].mxu0 %vm6422_vm14, %v3686_v7  ;;  %vm6427_vm14 = vmmov %vm6424_vm0 }
 0x12b   : > { %1752 = vmatprep.mubr.f32.mxu0 %v4725_v14 }
 0x12e   : > { %3699 = vmatmul.mubr.msk.f32.gmra.mrb[8].mxu0 %vm6423_vm9, %v3687_v59  ;;  %vm6428_vm9 = vmmov %vm6424_vm0 }
 0x12f   : > { %1758 = vmatprep.mubr.f32.mxu0 %v4725_v14 }
 0x132   : > { %3700 = vmatmul.mubr.msk.f32.gmra.mrb[10].mxu0 %vm6418_vm8, %v3688_v16  ;;  %vm6429_vm8 = vmmov %vm6424_vm0 }
 0x133   : > { %1917 = vmatprep.mubr.f32.mxu0 %v4725_v14 }
 0x136   : > { %3717 = vmatmul.mubr.msk.f32.vlgmr.msra.gmra.mrb[0].mxu0 %vm6424_vm0, %v3701_v55  ;;  %vm6430_vm0 = vcmp.lt.s32.totalorder %v4913_v20, 16 }
 0x137   : > { %1923 = vmatprep.mubr.f32.mxu0 %v4725_v14 }
 0x13a   : > { %3718 = vmatmul.mubr.msk.f32.gmra.mrb[2].mxu0 %vm6425_vm10, %v3702_v48  ;;  %vm6431_vm10 = vmmov %vm6430_vm0 }
 0x13b   : > { %1929 = vmatprep.mubr.f32.mxu0 %v4725_v14 }
 0x13e   : > { %3719 = vmatmul.mubr.msk.f32.gmra.mrb[4].mxu0 %vm6426_vm13, %v3703_v49  ;;  %vm6432_vm13 = vmmov %vm6430_vm0 }
 0x13f   : > { %1935 = vmatprep.mubr.f32.mxu0 %v4725_v14 }
 0x142   : > { %3720 = vmatmul.mubr.msk.f32.gmra.mrb[6].mxu0 %vm6427_vm14, %v3704_v54  ;;  %vm6433_vm14 = vmmov %vm6430_vm0 }
 0x143   : > { %1941 = vmatprep.mubr.f32.mxu0 %v4725_v14  ;;  %v1980_v11 = vpop.permute.xlu1 %1979 }
 0x144   : > { %v1975_v21 = vpop.permute.xlu0 %1974 }
 0x146   : > { %3721 = vmatmul.mubr.msk.f32.gmra.mrb[8].mxu0 %vm6428_vm9, %v3705_v56  ;;  %vm6434_vm9 = vmmov %vm6430_vm0 }
 0x147   : > { %1947 = vmatprep.mubr.f32.mxu0 %v4725_v14  ;;  %v1985_v35 = vpop.permute.xlu1 %1984 }
 0x148   : > { %v1990_v7 = vpop.permute.xlu0 %1989 }
 0x14a   : > { %3722 = vmatmul.mubr.msk.f32.gmra.mrb[10].mxu0 %vm6429_vm8, %v3706_v57  ;;  %vm6435_vm8 = vmmov %vm6430_vm0 }
 0x1b2   : > { %v530_v46 = vpop.f32.mrb[0].mxu1 }
 0x1b3   : > { %v532_v47 = vpop.f32.mrb[1].mxu1 }
 0x1b6   : > { %v536_v62 = vpop.f32.mrb[2].mxu1 }
 0x1b7   : > { %v538_v9 = vpop.f32.mrb[3].mxu1 }
 0x1ba   : > { %v542_v63 = vpop.f32.mrb[4].mxu1 }
 0x1bb   : > { %v544_v15 = vpop.f32.mrb[5].mxu1 }
 0x1cb   : > { %v673_v60 = vpop.f32.mrb[6].mxu1 }
 0x1cc   : > { %v675_v23 = vpop.f32.mrb[7].mxu1 }
 0x1cf   : > { %v679_v25 = vpop.f32.mrb[8].mxu1 }
 0x1d0   : > { %v681_v36 = vpop.f32.mrb[9].mxu1 }
 0x1d3   : > { %v685_v51 = vpop.f32.mrb[10].mxu1 }
 0x1d4   : > { %v687_v0 = vpop.f32.mrb[11].mxu1 }
 0x209   : > { %v1919_v1 = vpop.f32.mrb[0].mxu0 }
 0x20a   : > { %v4136_v58 = vadd.f32 %v1919_v1, %v530_v46  ;;  %v1921_v61 = vpop.f32.mrb[1].mxu0 }
 0x20b   : > { %v4137_v2 = vadd.f32 %v1921_v61, %v532_v47 }
 0x20c   : > { %v2002_v26 = vadd.f32 %v4136_v58, %v1975_v21 }
 0x20d   : > { %v1925_v22 = vpop.f32.mrb[2].mxu0  ;;  %v2003_v29 = vadd.f32 %v4137_v2, %v1975_v21 }
 0x20e   : > { %v4138_v10 = vadd.f32 %v1925_v22, %v536_v62  ;;  %v1927_v27 = vpop.f32.mrb[3].mxu0  ;;  %v2014_v40 = vmax.f32 %v2002_v26, 0.0 }
 0x20f   : > { %v4139_v24 = vadd.f32 %v1927_v27, %v538_v9  ;;  %v2015_v4 = vmax.f32 %v2003_v29, 0.0 }
 0x210   : > { %v2004_v38 = vadd.f32 %v4138_v10, %v1980_v11 }
 0x211   : > { %v2005_v3 = vadd.f32 %v4139_v24, %v1980_v11  ;;  %v1931_v30 = vpop.f32.mrb[4].mxu0 }
 0x212   : > { %v2016_v41 = vmax.f32 %v2004_v38, 0.0  ;;  %v4140_v31 = vadd.f32 %v1931_v30, %v542_v63  ;;  %v1933_v32 = vpop.f32.mrb[5].mxu0  ;;  %v3420_v30 = vld [vmem:[%s6329_s5] sm:$0xff] }
 0x213   : > { %v2017_v5 = vmax.f32 %v2005_v3, 0.0  ;;  %v4141_v28 = vadd.f32 %v1933_v32, %v544_v15  ;;  %v1995_v15 = vpop.permute.xlu1 %1994 }
 0x214   : > { %v2006_v17 = vadd.f32 %v4140_v31, %v1985_v35  ;;  %v5739_v13 = vpack.i.bf16 %v2016_v41, %v2014_v40  ;;  %v5749_v46 = vpack.c.bf16 %v2016_v41, %v2014_v40  ;;  %v3422_v40 = vld [vmem:[%s6329_s5 + $0x10] sm:$0xff]  ;;  %v3423_v41 = vld [vmem:[%s6329_s5 + $0x18] sm:$0xff] }
 0x215   : > { %v1937_v18 = vpop.f32.mrb[6].mxu0  ;;  %v5741_v12 = vpack.i.bf16 %v2017_v5, %v2015_v4  ;;  %v2007_v19 = vadd.f32 %v4141_v28, %v1985_v35  ;;  %v5747_v57 = vpack.c.bf16 %v2017_v5, %v2015_v4  ;;  %v3421_v35 = vld [vmem:[%s6329_s5 + $0x8] sm:$0xff] }
 0x216   : > { %v4142_v43 = vadd.f32 %v1937_v18, %v673_v60  ;;  %4477 = vrot.lane.b32.xlu1 %v5739_v13, %s4731_s13  ;;  %v1939_v33 = vpop.f32.mrb[7].mxu0  ;;  %v2018_v52 = vmax.f32 %v2006_v17, 0.0 }
 0x217   : > { %v4143_v59 = vadd.f32 %v1939_v33, %v675_v23  ;;  %4482 = vrot.lane.b32.xlu0 %v5741_v12, %s4731_s13  ;;  %v2019_v47 = vmax.f32 %v2007_v19, 0.0 }
 0x218   : > { %v2008_v16 = vadd.f32 %v4142_v43, %v1990_v7 }
 0x219   : > { %v2009_v55 = vadd.f32 %v4143_v59, %v1990_v7  ;;  %v1943_v48 = vpop.f32.mrb[8].mxu0 }
 0x21a   : > { %v2020_v49 = vmax.f32 %v2008_v16, 0.0  ;;  %v4144_v54 = vadd.f32 %v1943_v48, %v679_v25  ;;  %v1945_v56 = vpop.f32.mrb[9].mxu0  ;;  %v2000_v25 = vpop.permute.xlu0 %1999 }
 0x21b   : > { %v2021_v62 = vmax.f32 %v2009_v55, 0.0  ;;  %v4145_v9 = vadd.f32 %v1945_v56, %v681_v36 }
 0x21c   : > { %v5751_v63 = vpack.i.bf16 %v2020_v49, %v2018_v52  ;;  %v2010_v1 = vadd.f32 %v4144_v54, %v1995_v15  ;;  %v5758_v27 = vpack.c.bf16 %v2020_v49, %v2018_v52 }
 0x21d   : > { %v1949_v60 = vpop.f32.mrb[10].mxu0  ;;  %v4491_v23 = vpack.i.bf16 %v2021_v62, %v2019_v47  ;;  %v2011_v2 = vadd.f32 %v4145_v9, %v1995_v15  ;;  %v5756_v10 = vpack.c.bf16 %v2021_v62, %v2019_v47 }
 0x21e   : > { %v4146_v58 = vadd.f32 %v1949_v60, %v685_v51  ;;  %4487 = vrot.lane.b32.xlu1 %v5751_v63, %s4731_s13  ;;  %v1951_v61 = vpop.f32.mrb[11].mxu0  ;;  %v2022_v26 = vmax.f32 %v2010_v1, 0.0 }
 0x21f   : > { %v4147_v21 = vadd.f32 %v1951_v61, %v687_v0  ;;  %4492 = vrot.lane.b32.xlu0 %v4491_v23, %s4731_s13  ;;  %v2023_v29 = vmax.f32 %v2011_v2, 0.0 }
 0x220   : > { %v2012_v11 = vadd.f32 %v4146_v58, %v2000_v25 }
 0x221   : > { %v2013_v22 = vadd.f32 %v4147_v21, %v2000_v25 }
 0x222   : > { %v2024_v36 = vmax.f32 %v2012_v11, 0.0 }
 0x223   : > { %v2025_v24 = vmax.f32 %v2013_v22, 0.0 }
 0x224   : > { %v4496_v51 = vpack.i.bf16 %v2024_v36, %v2022_v26  ;;  %v5764_v0 = vpack.c.bf16 %v2024_v36, %v2022_v26 }
 0x225   : > { %v4501_v38 = vpack.i.bf16 %v2025_v24, %v2023_v29  ;;  %v5762_v3 = vpack.c.bf16 %v2025_v24, %v2023_v29 }
 0x226   : > { %4497 = vrot.lane.b32.xlu1 %v4496_v51, %s4731_s13 }
 0x227   : > { %4502 = vrot.lane.b32.xlu0 %v4501_v38, %s4731_s13 }
 0x22a   : > { %4507 = vrot.lane.b32.xlu1 %v5739_v13, %s4724_s7 }
 0x22b   : > { %4512 = vrot.lane.b32.xlu0 %v5741_v12, %s4724_s7 }
 0x22e   : > { %4517 = vrot.lane.b32.xlu1 %v5751_v63, %s4724_s7 }
 0x22f   : > { %4522 = vrot.lane.b32.xlu0 %v4491_v23, %s4724_s7 }
 0x232   : > { %4527 = vrot.lane.b32.xlu1 %v4496_v51, %s4724_s7 }
 0x233   : > { %4532 = vrot.lane.b32.xlu0 %v4501_v38, %s4724_s7 }
 0x236   : > { %4537 = vrot.lane.b32.xlu1 %v5739_v13, %s4726_s8 }
 0x237   : > { %4542 = vrot.lane.b32.xlu0 %v5741_v12, %s4726_s8 }
 0x23a   : > { %4547 = vrot.lane.b32.xlu1 %v5751_v63, %s4726_s8 }
 0x23b   : > { %4552 = vrot.lane.b32.xlu0 %v4491_v23, %s4726_s8 }
 0x23e   : > { %4557 = vrot.lane.b32.xlu1 %v4496_v51, %s4726_s8 }
 0x23f   : > { %4562 = vrot.lane.b32.xlu0 %v4501_v38, %s4726_s8 }
 0x242   : > { %4567 = vrot.lane.b32.xlu1 %v5739_v13, %s4727_s9 }
 0x243   : > { %4572 = vrot.lane.b32.xlu0 %v5741_v12, %s4727_s9 }
 0x246   : > { %4577 = vrot.lane.b32.xlu1 %v5751_v63, %s4727_s9 }
 0x247   : > { %4582 = vrot.lane.b32.xlu0 %v4491_v23, %s4727_s9 }
 0x24a   : > { %4587 = vrot.lane.b32.xlu1 %v4496_v51, %s4727_s9 }
 0x24b   : > { %4592 = vrot.lane.b32.xlu0 %v4501_v38, %s4727_s9 }
 0x24e   : > { %4597 = vrot.lane.b32.xlu1 %v5739_v13, %s4728_s10 }
 0x24f   : > { %4602 = vrot.lane.b32.xlu0 %v5741_v12, %s4728_s10 }
 0x252   : > { %4607 = vrot.lane.b32.xlu1 %v5751_v63, %s4728_s10 }
 0x253   : > { %4612 = vrot.lane.b32.xlu0 %v4491_v23, %s4728_s10 }
 0x256   : > { %4617 = vrot.lane.b32.xlu1 %v4496_v51, %s4728_s10 }
 0x257   : > { %4622 = vrot.lane.b32.xlu0 %v4501_v38, %s4728_s10 }
 0x25a   : > { %4627 = vrot.lane.b32.xlu1 %v5739_v13, %s4729_s11 }
 0x25b   : > { %4632 = vrot.lane.b32.xlu0 %v5741_v12, %s4729_s11 }
 0x25e   : > { %4637 = vrot.lane.b32.xlu1 %v5751_v63, %s4729_s11 }
 0x25f   : > { %4642 = vrot.lane.b32.xlu0 %v4491_v23, %s4729_s11 }
 0x262   : > { %4647 = vrot.lane.b32.xlu1 %v4496_v51, %s4729_s11 }
 0x263   : > { %4652 = vrot.lane.b32.xlu0 %v4501_v38, %s4729_s11 }
 0x266   : > { %4657 = vrot.lane.b32.xlu1 %v5739_v13, %s4730_s12 }
 0x267   : > { %4662 = vrot.lane.b32.xlu0 %v5741_v12, %s4730_s12 }
 0x26a   : > { %4667 = vrot.lane.b32.xlu1 %v5751_v63, %s4730_s12 }
 0x26b   : > { %4672 = vrot.lane.b32.xlu0 %v4491_v23, %s4730_s12 }
 0x26e   : > { %4677 = vrot.lane.b32.xlu1 %v4496_v51, %s4730_s12 }
 0x26f   : > { %4682 = vrot.lane.b32.xlu0 %v4501_v38, %s4730_s12 }
 0x272   : > { %4687 = vrot.lane.b32.xlu1 %v5739_v13, %s4732_s14 }
 0x273   : > { %4692 = vrot.lane.b32.xlu0 %v5741_v12, %s4732_s14 }
 0x276   : > { %4697 = vrot.lane.b32.xlu1 %v5751_v63, %s4732_s14 }
 0x277   : > { %4702 = vrot.lane.b32.xlu0 %v4491_v23, %s4732_s14 }
 0x27a   : > { %4707 = vrot.lane.b32.xlu1 %v4496_v51, %s4732_s14 }
 0x27b   : > { %4712 = vrot.lane.b32.xlu0 %v4501_v38, %s4732_s14 }
 0x27e   : > { %3426 = vperm.xlu1 %4475, %v3420_v30  }
 0x27f   : > { %3431 = vperm.xlu0 %4474, %v3421_v35  }
 0x282   : > { %3436 = vperm.xlu1 %4475, %v3422_v40  }
 0x283   : > { %3441 = vperm.xlu0 %4474, %v3423_v41  }
 0x288   : > { %v4478_v31 = vpop.permute.xlu1 %4477 }
 0x289   : > { %v4480_v32 = vunpack.i.h.bf16 %v4478_v31  ;;  %v4479_v4 = vunpack.i.l.bf16 %v4478_v31  ;;  %v4483_v5 = vpop.permute.xlu0 %4482 }
 0x28a   : > { %v4485_v28 = vunpack.i.h.bf16 %v4483_v5  ;;  %v4484_v17 = vunpack.i.l.bf16 %v4483_v5 }
 0x28c   : > { %v2109_v13 = vsel %vm6430_vm0, %v4485_v28, %v4480_v32  ;;  %v2108_v18 = vsel %vm6431_vm10, %v4484_v17, %v4479_v4  ;;  %v2102_v12 = vsel %vm6432_vm13, %v4479_v4, %v4484_v17  ;;  %v2103_v19 = vsel %vm6433_vm14, %v4480_v32, %v4485_v28  ;;  %vm6436_vm10 = vmmov %vm6430_vm0  ;;  %v3723_v32 = vld [vmem:[%s6328_s4 + $0x20] sm:$0xff] }
 0x28d   : > { %v3982_v43 = vpack.c.bf16 %v2109_v13, %v2108_v18  ;;  %v3980_v33 = vpack.c.bf16 %v2103_v19, %v2102_v12  ;;  %vm6437_vm13 = vmmov %vm6430_vm0 }
 0x28e   : > { %vm6438_vm14 = vmmov %vm6430_vm0 }
 0x28f   : > { %3981 = vmatprep.subr.bf16.mxu1 %v3980_v33 }
 0x290   : > { %3984 = vmatpush1.bf16.msk.msra.mxu1 %vm5297_vm2, %v3982_v43  ;;  %v4488_v52 = vpop.permute.xlu1 %4487 }
 0x291   : > { %v4490_v7 = vunpack.i.h.bf16 %v4488_v52  ;;  %v4489_v59 = vunpack.i.l.bf16 %v4488_v52  ;;  %v4493_v16 = vpop.permute.xlu0 %4492 }
 0x292   : > { %v4495_v55 = vunpack.i.h.bf16 %v4493_v16  ;;  %v4494_v48 = vunpack.i.l.bf16 %v4493_v16 }
 0x294   : > { %v2111_v49 = vsel %vm6434_vm9, %v4495_v55, %v4490_v7  ;;  %v2110_v54 = vsel %vm6435_vm8, %v4494_v48, %v4489_v59  ;;  %v2104_v56 = vsel %vm6430_vm0, %v4489_v59, %v4494_v48  ;;  %v2105_v47 = vsel %vm6436_vm10, %v4490_v7, %v4495_v55  ;;  %vm6439_vm9 = vmmov %vm6430_vm0  ;;  %v3724_v7 = vld [vmem:[%s6328_s4 + $0x28] sm:$0xff] }
 0x295   : > { %v3987_v62 = vpack.c.bf16 %v2111_v49, %v2110_v54  ;;  %v3985_v9 = vpack.c.bf16 %v2105_v47, %v2104_v56  ;;  %vm6440_vm8 = vmmov %vm6430_vm0  ;;  %vm2131_vm0 = vcmask 392192   ;;  %vm6441_vm10 = vcmp.lt.s32.totalorder %v4913_v20, 17 }
 0x297   : > { %3986 = vmatprep.subr.bf16.mxu1 %v3985_v9 }
 0x298   : > { %3989 = vmatpush1.bf16.msk.msra.mxu1 %vm5297_vm2, %v3987_v62  ;;  %v4498_v63 = vpop.permute.xlu1 %4497 }
 0x299   : > { %v4500_v15 = vunpack.i.h.bf16 %v4498_v63  ;;  %v4499_v60 = vunpack.i.l.bf16 %v4498_v63  ;;  %v4503_v23 = vpop.permute.xlu0 %4502 }
 0x29a   : > { %v4505_v1 = vunpack.i.h.bf16 %v4503_v23  ;;  %v4504_v58 = vunpack.i.l.bf16 %v4503_v23 }
 0x29c   : > { %v2113_v61 = vsel %vm6437_vm13, %v4505_v1, %v4500_v15  ;;  %v2112_v25 = vsel %vm6438_vm14, %v4504_v58, %v4499_v60  ;;  %v4508_v2 = vpop.permute.xlu1 %4507  ;;  %v2106_v21 = vsel %vm6439_vm9, %v4499_v60, %v4504_v58  ;;  %v2107_v11 = vsel %vm6440_vm8, %v4500_v15, %v4505_v1  ;;  %vm6442_vm13 = vmmov %vm6441_vm10  ;;  %v3725_v60 = vld [vmem:[%s6328_s4 + $0x30] sm:$0xff] }
 0x29d   : > { %v3992_v22 = vpack.c.bf16 %v2113_v61, %v2112_v25  ;;  %v4510_v26 = vunpack.i.h.bf16 %v4508_v2  ;;  %v4509_v36 = vunpack.i.l.bf16 %v4508_v2  ;;  %v4513_v29 = vpop.permute.xlu0 %4512  ;;  %v3990_v24 = vpack.c.bf16 %v2107_v11, %v2106_v21  ;;  %vm6443_vm14 = vmmov %vm6441_vm10 }
 0x29e   : > { %v4515_v51 = vunpack.i.h.bf16 %v4513_v29  ;;  %v4514_v38 = vunpack.i.l.bf16 %v4513_v29  ;;  %vm6444_vm9 = vmmov %vm6441_vm10 }
 0x29f   : > { %3991 = vmatprep.subr.bf16.mxu1 %v3990_v24  ;;  %vm6445_vm8 = vmmov %vm6444_vm9 }
 0x2a0   : > { %v2051_v30 = vsel %vm6441_vm10, %v4510_v26, %v4515_v51  ;;  %v2057_v35 = vsel %vm6442_vm13, %v4515_v51, %v4510_v26  ;;  %v2050_v40 = vsel %vm6443_vm14, %v4509_v36, %v4514_v38  ;;  %v2056_v41 = vsel %vm6444_vm9, %v4514_v38, %v4509_v36  ;;  %v4518_v31 = vpop.permute.xlu1 %4517  ;;  %3994 = vmatpush1.bf16.msk.msra.mxu1 %vm5297_vm2, %v3992_v22  ;;  %vm6446_vm2 = vmmov %vm6445_vm8  ;;  %v3726_v36 = vld [vmem:[%s6328_s4 + $0x38] sm:$0xff] }
 0x2a1   : > { %v3995_v4 = vpack.c.bf16 %v2051_v30, %v2050_v40  ;;  %v3998_v5 = vpack.c.bf16 %v2057_v35, %v2056_v41  ;;  %v4520_v28 = vunpack.i.h.bf16 %v4518_v31  ;;  %v4519_v17 = vunpack.i.l.bf16 %v4518_v31  ;;  %v4523_v13 = vpop.permute.xlu0 %4522  ;;  %vm6447_vm10 = vmmov %vm6446_vm2 }
 0x2a2   : > { %v4525_v18 = vunpack.i.h.bf16 %v4523_v13  ;;  %v4524_v12 = vunpack.i.l.bf16 %v4523_v13  ;;  %vm6448_vm13 = vmmov %vm6446_vm2 }
 0x2a3   : > { %3733 = vmatmul.mubr.msk.f32.vlgmr.msra.gmra.mrb[12].mxu1 %vm2131_vm0, %v3723_v32  ;;  %3997 = vmatprep.subr.msk.bf16.mxu1 %vm4949_vm5, %v3995_v4  ;;  %vm6449_vm14 = vmmov %vm6446_vm2  ;;  %v2074_v4 = vld [vmem:[%s6328_s4] sm:$0xff] }
 0x2a4   : > { %v2053_v42 = vsel %vm6445_vm8, %v4520_v28, %v4525_v18  ;;  %v2059_v19 = vsel %vm6446_vm2, %v4525_v18, %v4520_v28  ;;  %v2052_v43 = vsel %vm6447_vm10, %v4519_v17, %v4524_v12  ;;  %v2058_v33 = vsel %vm6448_vm13, %v4524_v12, %v4519_v17  ;;  %v4528_v52 = vpop.permute.xlu1 %4527  ;;  %4000 = vmatpush1.bf16.msk.msra.mxu1 %vm4964_vm6, %v3998_v5  ;;  %vm6450_vm9 = vmmov %vm6446_vm2 }
 0x2a5   : > { %v4001_v59 = vpack.c.bf16 %v2053_v42, %v2052_v43  ;;  %v4004_v16 = vpack.c.bf16 %v2059_v19, %v2058_v33  ;;  %v4530_v55 = vunpack.i.h.bf16 %v4528_v52  ;;  %v4529_v48 = vunpack.i.l.bf16 %v4528_v52  ;;  %v4533_v49 = vpop.permute.xlu0 %4532  ;;  %2214 = vmatprep.mubr.f32.mxu1 %v4725_v14  ;;  %vm6451_vm8 = vmmov %vm6446_vm2 }
 0x2a6   : > { %v4535_v54 = vunpack.i.h.bf16 %v4533_v49  ;;  %v4534_v56 = vunpack.i.l.bf16 %v4533_v49  ;;  %vm6452_vm10 = vcmp.lt.s32.totalorder %v4913_v20, 15 }
 0x2a7   : > { %3734 = vmatmul.mubr.msk.f32.gmra.mrb[14].mxu1 %vm2131_vm0, %v3724_v7  ;;  %4003 = vmatprep.subr.msk.bf16.mxu1 %vm4949_vm5, %v4001_v59  ;;  %vm6453_vm13 = vmmov %vm6452_vm10  ;;  %v2075_v59 = vld [vmem:[%s6328_s4 + $0x8] sm:$0xff] }
 0x2a8   : > { %v2055_v47 = vsel %vm6449_vm14, %v4530_v55, %v4535_v54  ;;  %v2061_v62 = vsel %vm6450_vm9, %v4535_v54, %v4530_v55  ;;  %v2054_v9 = vsel %vm6451_vm8, %v4529_v48, %v4534_v56  ;;  %v2060_v63 = vsel %vm6446_vm2, %v4534_v56, %v4529_v48  ;;  %v4538_v15 = vpop.permute.xlu1 %4537  ;;  %4006 = vmatpush1.bf16.msk.msra.mxu1 %vm4964_vm6, %v4004_v16  ;;  %vm6454_vm14 = vmmov %vm6452_vm10 }
 0x2a9   : > { %v4007_v23 = vpack.c.bf16 %v2055_v47, %v2054_v9  ;;  %v4010_v1 = vpack.c.bf16 %v2061_v62, %v2060_v63  ;;  %v4540_v58 = vunpack.i.h.bf16 %v4538_v15  ;;  %v4539_v61 = vunpack.i.l.bf16 %v4538_v15  ;;  %v4543_v25 = vpop.permute.xlu0 %4542  ;;  %2220 = vmatprep.mubr.f32.mxu1 %v4725_v14  ;;  %vm6455_vm9 = vmmov %vm6452_vm10 }
 0x2aa   : > { %v4545_v2 = vunpack.i.h.bf16 %v4543_v25  ;;  %v4544_v21 = vunpack.i.l.bf16 %v4543_v25 }
 0x2ab   : > { %3735 = vmatmul.mubr.msk.f32.gmra.mrb[16].mxu1 %vm2131_vm0, %v3725_v60  ;;  %4009 = vmatprep.subr.msk.bf16.mxu1 %vm4949_vm5, %v4007_v23  ;;  %v2076_v23 = vld [vmem:[%s6328_s4 + $0x10] sm:$0xff] }
 0x2ac   : > { %v2359_v11 = vsel %vm6452_vm10, %v4540_v58, %v4545_v2  ;;  %v2358_v22 = vsel %vm6453_vm13, %v4539_v61, %v4544_v21  ;;  %v4548_v26 = vpop.permute.xlu1 %4547  ;;  %4012 = vmatpush1.bf16.msk.msra.mxu1 %vm4964_vm6, %v4010_v1  ;;  %2226 = vmatprep.mubr.f32.mxu1 %v4725_v14  ;;  %v2365_v40 = vsel %vm6454_vm14, %v4545_v2, %v4540_v58  ;;  %vm6456_vm6 = vmmov %vm6455_vm9 }
 0x2ad   : > { %v4013_v29 = vpack.c.bf16 %v2359_v11, %v2358_v22  ;;  %v4550_v24 = vunpack.i.h.bf16 %v4548_v26  ;;  %v4549_v51 = vunpack.i.l.bf16 %v4548_v26  ;;  %v4553_v38 = vpop.permute.xlu0 %4552  ;;  %v2364_v41 = vsel %vm6455_vm9, %v4544_v21, %v4539_v61  ;;  %vm6457_vm8 = vmmov %vm6456_vm6  ;;  %v2077_v22 = vld [vmem:[%s6328_s4 + $0x18] sm:$0xff] }
 0x2ae   : > { %v4555_v30 = vunpack.i.h.bf16 %v4553_v38  ;;  %v4554_v35 = vunpack.i.l.bf16 %v4553_v38  ;;  %v4016_v18 = vpack.c.bf16 %v2365_v40, %v2364_v41  ;;  %vm6458_vm2 = vmmov %vm6456_vm6  ;;  %vm6462_vm9 = vnez %v6362_v37  ;;  %v3753_v41 = vld [vmem:[%s6328_s4 + $0x40] sm:$0xff] }
 0x2af   : > { %3736 = vmatmul.mubr.msk.f32.gmra.mrb[18].mxu1 %vm2131_vm0, %v3726_v36  ;;  %4015 = vmatprep.subr.msk.bf16.mxu1 %vm5026_vm12, %v4013_v29  ;;  %vm6459_vm10 = vmmov %vm6458_vm2 }
 0x2b0   : > { %v2361_v50 = vsel %vm6456_vm6, %v4550_v24, %v4555_v30  ;;  %v2360_v31 = vsel %vm6457_vm8, %v4549_v51, %v4554_v35  ;;  %v4558_v32 = vpop.permute.xlu1 %4557  ;;  %2309 = vmatprep.mubr.f32.mxu1 %v4725_v14  ;;  %v2367_v19 = vsel %vm6458_vm2, %v4555_v30, %v4550_v24  ;;  %v2366_v43 = vsel %vm6459_vm10, %v4554_v35, %v4549_v51  ;;  %vm6460_vm13 = vmmov %vm6458_vm2 }
 0x2b1   : > { %v4019_v5 = vpack.c.bf16 %v2361_v50, %v2360_v31  ;;  %v4560_v28 = vunpack.i.h.bf16 %v4558_v32  ;;  %v4559_v17 = vunpack.i.l.bf16 %v4558_v32  ;;  %v4563_v13 = vpop.permute.xlu0 %4562  ;;  %vm6461_vm14 = vmmov %vm6458_vm2  ;;  %v4022_v54 = vpack.c.bf16 %v2367_v19, %v2366_v43  ;;  %v3755_v19 = vld [vmem:[%s6328_s4 + $0x50] sm:$0xff] }
 0x2b2   : > { %v4565_v12 = vunpack.i.h.bf16 %v4563_v13  ;;  %v4564_v42 = vunpack.i.l.bf16 %v4563_v13  ;;  %vm6463_vm6 = vmmov %vm6458_vm2 }
 0x2b3   : > { %3749 = vmatmul.mubr.msk.f32.vlgmr.msra.gmra.mrb[12].mxu1 %vm2131_vm0, %v2074_v4  ;;  %vm6464_vm8 = vmmov %vm6458_vm2  ;;  %vm6465_vm2 = vcmp.lt.s32.totalorder %v4913_v20, 1 }
 0x2b4   : > { %v2363_v33 = vsel %vm6460_vm13, %v4560_v28, %v4565_v12  ;;  %v2362_v52 = vsel %vm6461_vm14, %v4559_v17, %v4564_v42  ;;  %4018 = vmatpush1.bf16.msk.msra.mxu1 %vm6462_vm9, %v4016_v18  ;;  %v4568_v7 = vpop.permute.xlu1 %4567  ;;  %2315 = vmatprep.mubr.f32.mxu1 %v4725_v14  ;;  %v2369_v62 = vsel %vm6463_vm6, %v4565_v12, %v4560_v28  ;;  %vm6466_vm10 = vmmov %vm6465_vm2 }
 0x2b5   : > { %v4025_v16 = vpack.c.bf16 %v2363_v33, %v2362_v52  ;;  %v4570_v55 = vunpack.i.h.bf16 %v4568_v7  ;;  %v4569_v48 = vunpack.i.l.bf16 %v4568_v7  ;;  %4021 = vmatprep.subr.msk.bf16.mxu1 %vm5026_vm12, %v4019_v5  ;;  %v4573_v49 = vpop.permute.xlu0 %4572  ;;  %v2368_v9 = vsel %vm6464_vm8, %v4564_v42, %v4559_v17  ;;  %vm6467_vm13 = vmmov %vm6465_vm2  ;;  %v3754_v17 = vld [vmem:[%s6328_s4 + $0x48] sm:$0xff]  ;;  %v3756_v7 = vld [vmem:[%s6328_s4 + $0x58] sm:$0xff] }
 0x2b6   : > { %v4575_v56 = vunpack.i.h.bf16 %v4573_v49  ;;  %v4574_v47 = vunpack.i.l.bf16 %v4573_v49  ;;  %v4028_v61 = vpack.c.bf16 %v2369_v62, %v2368_v9  ;;  %vm6468_vm14 = vmmov %vm6465_vm2 }
 0x2b7   : > { %3750 = vmatmul.mubr.msk.f32.gmra.mrb[14].mxu1 %vm2131_vm0, %v2075_v59  ;;  %vm6469_vm6 = vmmov %vm6465_vm2 }
 0x2b8   : > { %v2521_v63 = vsel %vm6465_vm2, %v4570_v55, %v4575_v56  ;;  %v2520_v15 = vsel %vm6466_vm10, %v4569_v48, %v4574_v47  ;;  %4024 = vmatpush1.bf16.msk.msra.mxu1 %vm6462_vm9, %v4022_v54  ;;  %v4578_v60 = vpop.permute.xlu1 %4577  ;;  %2321 = vmatprep.mubr.f32.mxu1 %v4725_v14  ;;  %v2527_v29 = vsel %vm6467_vm13, %v4575_v56, %v4570_v55  ;;  %vm6471_vm8 = vmmov %vm6465_vm2 }
 0x2b9   : > { %v4031_v1 = vpack.c.bf16 %v2521_v63, %v2520_v15  ;;  %4027 = vmatprep.subr.msk.bf16.mxu1 %vm5026_vm12, %v4025_v16  ;;  %v4583_v58 = vpop.permute.xlu0 %4582  ;;  %v4580_v25 = vunpack.i.h.bf16 %v4578_v60  ;;  %v4579_v2 = vunpack.i.l.bf16 %v4578_v60  ;;  %v2526_v24 = vsel %vm6468_vm14, %v4574_v47, %v4569_v48  ;;  %vm6472_vm10 = vmmov %vm6465_vm2  ;;  %v3773_v16 = vld [vmem:[%s6328_s4 + $0x60] sm:$0xff] }
 0x2ba   : > { %v4585_v21 = vunpack.i.h.bf16 %v4583_v58  ;;  %v4584_v11 = vunpack.i.l.bf16 %v4583_v58  ;;  %v4034_v50 = vpack.c.bf16 %v2527_v29, %v2526_v24  ;;  %vm6473_vm13 = vmmov %vm6465_vm2 }
 0x2bb   : > { %3751 = vmatmul.mubr.msk.f32.gmra.mrb[16].mxu1 %vm2131_vm0, %v2076_v23  ;;  %vm6474_vm14 = vmmov %vm6465_vm2 }
 0x2bc   : > { %4030 = vmatpush1.bf16.msk.msra.mxu1 %vm6462_vm9, %v4028_v61  ;;  %v4588_v26 = vpop.permute.xlu1 %4587  ;;  %2327 = vmatprep.mubr.f32.mxu1 %v4725_v14  ;;  %v2523_v37 = vsel %vm6469_vm6, %v4580_v25, %v4585_v21  ;;  %vm6470_vm9 = vmmov %vm6465_vm2  ;;  %v2529_v31 = vsel %vm6471_vm8, %v4585_v21, %v4580_v25  ;;  %v2528_v32 = vsel %vm6465_vm2, %v4584_v11, %v4579_v2 }
 0x2bd   : > { %4033 = vmatprep.subr.msk.bf16.mxu1 %vm4949_vm5, %v4031_v1  ;;  %v4593_v36 = vpop.permute.xlu0 %4592  ;;  %v2522_v51 = vsel %vm6470_vm9, %v4579_v2, %v4584_v11  ;;  %v4590_v38 = vunpack.i.h.bf16 %v4588_v26  ;;  %v4589_v30 = vunpack.i.l.bf16 %v4588_v26  ;;  %v4040_v13 = vpack.c.bf16 %v2529_v31, %v2528_v32  ;;  %vm6475_vm6 = vmmov %vm6465_vm2  ;;  %v3793_v26 = vld [vmem:[%s6328_s4 + $0x80] sm:$0xff]  ;;  %v3794_v32 = vld [vmem:[%s6328_s4 + $0x88] sm:$0xff] }
 0x2be   : > { %v4595_v35 = vunpack.i.h.bf16 %v4593_v36  ;;  %v4594_v40 = vunpack.i.l.bf16 %v4593_v36  ;;  %v4037_v4 = vpack.c.bf16 %v2523_v37, %v2522_v51 }
 0x2bf   : > { %3752 = vmatmul.mubr.msk.f32.gmra.mrb[18].mxu1 %vm2131_vm0, %v2077_v22 }
 0x2c0   : > { %2463 = vmatprep.mubr.f32.mxu1 %v4725_v14  ;;  %v2525_v5 = vsel %vm6472_vm10, %v4590_v38, %v4595_v35  ;;  %v2524_v28 = vsel %vm6473_vm13, %v4589_v30, %v4594_v40  ;;  %v2531_v18 = vsel %vm6474_vm14, %v4595_v35, %v4590_v38  ;;  %v2530_v12 = vsel %vm6475_vm6, %v4594_v40, %v4589_v30  ;;  %v4598_v33 = vpop.permute.xlu1 %4597 }
 0x2c1   : > { %v4043_v42 = vpack.c.bf16 %v2525_v5, %v2524_v28  ;;  %v4046_v43 = vpack.c.bf16 %v2531_v18, %v2530_v12  ;;  %v4603_v52 = vpop.permute.xlu0 %4602  ;;  %v4600_v55 = vunpack.i.h.bf16 %v4598_v33  ;;  %v4599_v48 = vunpack.i.l.bf16 %v4598_v33 }
 0x2c2   : > { %v4605_v49 = vunpack.i.h.bf16 %v4603_v52  ;;  %v4604_v54 = vunpack.i.l.bf16 %v4603_v52 }
 0x2c3   : > { %3769 = vmatmul.mubr.msk.f32.vlgmr.msra.gmra.mrb[12].mxu1 %vm2131_vm0, %v3753_v41 }
 0x2c4   : > { %4036 = vmatpush1.bf16.msk.msra.mxu1 %vm5099_vm4, %v4034_v50  ;;  %2469 = vmatprep.mubr.f32.mxu1 %v4725_v14  ;;  %v4608_v44 = vpop.permute.xlu1 %4607 }
 0x2c5   : > { %4039 = vmatprep.subr.msk.bf16.mxu1 %vm4949_vm5, %v4037_v4  ;;  %v4613_v59 = vpop.permute.xlu0 %4612  ;;  %v4610_v63 = vunpack.i.h.bf16 %v4608_v44  ;;  %v4609_v15 = vunpack.i.l.bf16 %v4608_v44 }
 0x2c6   : > { %v4615_v60 = vunpack.i.h.bf16 %v4613_v59  ;;  %v4614_v23 = vunpack.i.l.bf16 %v4613_v59 }
 0x2c7   : > { %3770 = vmatmul.mubr.msk.f32.gmra.mrb[14].mxu1 %vm2131_vm0, %v3754_v17 }
 0x2c8   : > { %4042 = vmatpush1.bf16.msk.msra.mxu1 %vm5099_vm4, %v4040_v13  ;;  %2475 = vmatprep.mubr.f32.mxu1 %v4725_v14  ;;  %v4618_v56 = vpop.permute.xlu1 %4617 }
 0x2c9   : > { %4045 = vmatprep.subr.msk.bf16.mxu1 %vm4949_vm5, %v4043_v42  ;;  %v4623_v47 = vpop.permute.xlu0 %4622  ;;  %vm6476_vm5 = vcmp.lt.s32.totalorder %v4913_v20, 127  ;;  %v4620_v2 = vunpack.i.h.bf16 %v4618_v56  ;;  %v4619_v21 = vunpack.i.l.bf16 %v4618_v56 }
 0x2ca   : > { %v2803_v62 = vsel %vm6476_vm5, %v4605_v49, %v4600_v55  ;;  %vm6477_vm9 = vmmov %vm6476_vm5  ;;  %v4625_v11 = vunpack.i.h.bf16 %v4623_v47  ;;  %v4624_v22 = vunpack.i.l.bf16 %v4623_v47 }
 0x2cb   : > { %3771 = vmatmul.mubr.msk.f32.gmra.mrb[16].mxu1 %vm2131_vm0, %v3755_v19  ;;  %v2802_v9 = vsel %vm6477_vm9, %v4604_v54, %v4599_v48  ;;  %vm6478_vm8 = vmmov %vm6476_vm5  ;;  %v3795_v19 = vld [vmem:[%s6328_s4 + $0x90] sm:$0xff] }
 0x2cc   : > { %4048 = vmatpush1.bf16.msk.msra.mxu1 %vm5099_vm4, %v4046_v43  ;;  %2481 = vmatprep.mubr.f32.mxu1 %v4725_v14  ;;  %v6062_v1 = vpop.permute.xlu1 %4627  ;;  %vm6479_vm2 = vmmov %vm6476_vm5 }
 0x2cd   : > { %4050 = vmatprep.subr.bf16.mxu1 %v5747_v57  ;;  %v3774_v57 = vld [vmem:[%s6328_s4 + $0x68] sm:$0xff]  ;;  %v4633_v58 = vpop.permute.xlu0 %4632  ;;  %v2796_v61 = vsel %vm6479_vm2, %v4599_v48, %v4604_v54  ;;  %vm6480_vm10 = vmmov %vm6479_vm2  ;;  %v4630_v30 = vunpack.i.h.bf16 %v6062_v1  ;;  %v4629_v35 = vunpack.i.l.bf16 %v6062_v1  ;;  %v2800_v28 = vsel %vm6479_vm2, %v4619_v21, %v4624_v22 }
 0x2ce   : > { %v2805_v25 = vsel %vm6480_vm10, %v4615_v60, %v4610_v63  ;;  %vm6481_vm13 = vmmov %vm6479_vm2  ;;  %v4635_v40 = vunpack.i.h.bf16 %v4633_v58  ;;  %v4634_v41 = vunpack.i.l.bf16 %v4633_v58  ;;  %vm6487_vm10 = vcmp.lt.s32.totalorder %v4913_v20, 113 }
 0x2cf   : > { %3772 = vmatmul.mubr.msk.f32.gmra.mrb[18].mxu1 %vm2131_vm0, %v3756_v7  ;;  %vm6482_vm14 = vmmov %vm6479_vm2 }
 0x2d0   : > { %2625 = vmatprep.mubr.f32.mxu1 %v4725_v14  ;;  %v2799_v29 = vsel %vm6482_vm14, %v4610_v63, %v4615_v60  ;;  %vm6483_vm6 = vmmov %vm6479_vm2  ;;  %v4638_v51 = vpop.permute.xlu1 %4637  ;;  %v2965_v13 = vsel %vm6487_vm10, %v4635_v40, %v4630_v30 }
 0x2d1   : > { %v2798_v24 = vsel %vm6483_vm6, %v4609_v15, %v4614_v23  ;;  %v4643_v38 = vpop.permute.xlu0 %4642  ;;  %vm6484_vm5 = vmmov %vm6479_vm2  ;;  %v4640_v52 = vunpack.i.h.bf16 %v4638_v51  ;;  %v4639_v7 = vunpack.i.l.bf16 %v4638_v51 }
 0x2d2   : > { %v2807_v50 = vsel %vm6484_vm5, %v4625_v11, %v4620_v2  ;;  %vm6485_vm9 = vmmov %vm6479_vm2  ;;  %v4070_v4 = vpack.c.bf16 %v2799_v29, %v2798_v24  ;;  %v4645_v44 = vunpack.i.h.bf16 %v4643_v38  ;;  %v4644_v59 = vunpack.i.l.bf16 %v4643_v38  ;;  %v3803_v24 = vld [vmem:[%s6328_s4 + $0xb0] sm:$0xff] }
 0x2d3   : > { %3789 = vmatmul.mubr.msk.f32.vlgmr.msra.gmra.mrb[12].mxu1 %vm2131_vm0, %v3773_v16  ;;  %v2806_v31 = vsel %vm6485_vm9, %v4624_v22, %v4619_v21  ;;  %v3796_v16 = vld [vmem:[%s6328_s4 + $0x98] sm:$0xff]  ;;  %vm6490_vm14 = vmmov %vm6487_vm10 }
 0x2d4   : > { %4052 = vmatpush1.bf16.msra.mxu1 %v5749_v46  ;;  %2631 = vmatprep.mubr.f32.mxu1 %v4725_v14  ;;  %v3775_v46 = vld [vmem:[%s6328_s4 + $0x70] sm:$0xff]  ;;  %v4073_v17 = vpack.c.bf16 %v2807_v50, %v2806_v31  ;;  %v4648_v12 = vpop.permute.xlu1 %4647  ;;  %vm6491_vm6 = vmmov %vm6487_vm10 }
 0x2d5   : > { %4054 = vmatprep.subr.bf16.mxu1 %v5756_v10  ;;  %v4061_v10 = vpack.c.bf16 %v2803_v62, %v2802_v9  ;;  %v4653_v42 = vpop.permute.xlu0 %4652  ;;  %v2967_v54 = vsel %vm6491_vm6, %v4645_v44, %v4640_v52  ;;  %vm6492_vm5 = vmmov %vm6491_vm6  ;;  %v4650_v56 = vunpack.i.h.bf16 %v4648_v12  ;;  %v4649_v47 = vunpack.i.l.bf16 %v4648_v12 }
 0x2d6   : > { %v4655_v62 = vunpack.i.h.bf16 %v4653_v42  ;;  %v4654_v9 = vunpack.i.l.bf16 %v4653_v42  ;;  %vm6493_vm9 = vmmov %vm6492_vm5  ;;  %v3821_v42 = vld [vmem:[%s6328_s4 + $0xc0] sm:$0xff] }
 0x2d7   : > { %3790 = vmatmul.mubr.msk.f32.gmra.mrb[14].mxu1 %vm2131_vm0, %v3774_v57  ;;  %v2966_v57 = vsel %vm6492_vm5, %v4644_v59, %v4639_v7  ;;  %v2961_v63 = vsel %vm6493_vm9, %v4640_v52, %v4645_v44 }
 0x2d8   : > { %4056 = vmatpush1.bf16.msra.mxu1 %v5758_v27  ;;  %2637 = vmatprep.mubr.f32.mxu1 %v4725_v14  ;;  %v3776_v27 = vld [vmem:[%s6328_s4 + $0x78] sm:$0xff]  ;;  %v4658_v34 = vpop.permute.xlu1 %4657  ;;  %v4085_v60 = vpack.c.bf16 %v2967_v54, %v2966_v57 }
 0x2d9   : > { %4058 = vmatprep.subr.bf16.mxu1 %v5762_v3  ;;  %v2797_v3 = vsel %vm6478_vm8, %v4600_v55, %v4605_v49  ;;  %vm6486_vm8 = vmmov %vm6479_vm2  ;;  %v4663_v55 = vpop.permute.xlu0 %4662  ;;  %v2958_v49 = vsel %vm6490_vm14, %v4629_v35, %v4634_v41  ;;  %v4659_v1 = vunpack.i.l.bf16 %v4658_v34  ;;  %vm6499_vm14 = vcmp.lt.s32.totalorder %v4913_v20, 112  ;;  %v3844_v20 = vld [vmem:[%s6328_s4 + $0xf8] sm:$0xff] }
 0x2da   : > { %v4064_v36 = vpack.c.bf16 %v2797_v3, %v2796_v61  ;;  %v2801_v5 = vsel %vm6486_vm8, %v4620_v2, %v4625_v11  ;;  %vm6494_vm8 = vmmov %vm6492_vm5  ;;  %v4665_v58 = vunpack.i.h.bf16 %v4663_v55  ;;  %v3802_v2 = vld [vmem:[%s6328_s4 + $0xa8] sm:$0xff] }
 0x2db   : > { %3791 = vmatmul.mubr.msk.f32.gmra.mrb[16].mxu1 %vm2131_vm0, %v3775_v46  ;;  %v4076_v43 = vpack.c.bf16 %v2801_v5, %v2800_v28  ;;  %v3801_v46 = vld [vmem:[%s6328_s4 + $0xa0] sm:$0xff]  ;;  %vm6495_vm2 = vmmov %vm6492_vm5 }
 0x2dc   : > { %4060 = vmatpush1.bf16.msra.mxu1 %v5764_v0  ;;  %2643 = vmatprep.mubr.f32.mxu1 %v4725_v14  ;;  %v2804_v0 = vsel %vm6481_vm13, %v4614_v23, %v4609_v15  ;;  %vm6488_vm13 = vmmov %vm6487_vm10  ;;  %v2960_v15 = vsel %vm6494_vm8, %v4639_v7, %v4644_v59  ;;  %v4660_v23 = vunpack.i.h.bf16 %v4658_v34  ;;  %v2969_v3 = vsel %vm6495_vm2, %v4655_v62, %v4650_v56 }
 0x2dd   : > { %4063 = vmatprep.subr.msk.bf16.mxu1 %vm5026_vm12, %v4061_v10  ;;  %v4067_v37 = vpack.c.bf16 %v2805_v25, %v2804_v0  ;;  %v2964_v18 = vsel %vm6488_vm13, %v4634_v41, %v4629_v35  ;;  %v4668_v25 = vpop.permute.xlu1 %4667  ;;  %v4673_v0 = vpop.permute.xlu0 %4672  ;;  %v4088_v21 = vpack.c.bf16 %v2961_v63, %v2960_v15  ;;  %vm6497_vm13 = vmmov %vm6495_vm2 }
 0x2de   : > { %v4079_v33 = vpack.c.bf16 %v2965_v13, %v2964_v18  ;;  %v2963_v11 = vsel %vm6497_vm13, %v4650_v56, %v4655_v62  ;;  %vm6500_vm6 = vmmov %vm6499_vm14  ;;  %v4670_v35 = vunpack.i.h.bf16 %v4668_v25  ;;  %v4675_v41 = vunpack.i.h.bf16 %v4673_v0 }
 0x2df   : > { %3792 = vmatmul.mubr.msk.f32.gmra.mrb[18].mxu1 %vm2131_vm0, %v3776_v27  ;;  %v4664_v27 = vunpack.i.l.bf16 %v4663_v55  ;;  %v4674_v50 = vunpack.i.l.bf16 %v4673_v0  ;;  %vm6502_vm5 = vmmov %vm6500_vm6 }
 0x2e0   : > { %2739 = vmatprep.mubr.f32.mxu1 %v4725_v14  ;;  %vm6503_vm9 = vmmov %vm6502_vm5 }
 0x2e1   : > { %v3126_v29 = vsel %vm6500_vm6, %v4664_v27, %v4659_v1  ;;  %v4678_v38 = vpop.permute.xlu1 %4677 }
 0x2e2   : > { %v4680_v5 = vunpack.i.h.bf16 %v4678_v38  ;;  %v4679_v28 = vunpack.i.l.bf16 %v4678_v38 }
 0x2e3   : > { %3797 = vmatmul.mubr.msk.f32.vlgmr.msra.gmra.mrb[12].mxu1 %vm2131_vm0, %v3793_v26 }
 0x2e4   : > { %4066 = vmatpush1.bf16.msk.msra.mxu1 %vm5315_vm15, %v4064_v36  ;;  %2745 = vmatprep.mubr.f32.mxu1 %v4725_v14  ;;  %v3127_v36 = vsel %vm6499_vm14, %v4665_v58, %v4660_v23 }
 0x2e5   : > { %4069 = vmatprep.subr.msk.bf16.mxu1 %vm5026_vm12, %v4067_v37  ;;  %v4097_v51 = vpack.c.bf16 %v3127_v36, %v3126_v29  ;;  %v4688_v18 = vpop.permute.xlu1 %4687  ;;  %v3841_v36 = vld [vmem:[%s6328_s4 + $0xe0] sm:$0xff] }
 0x2e6   : > { %v4690_v7 = vunpack.i.h.bf16 %v4688_v18  ;;  %v4689_v44 = vunpack.i.l.bf16 %v4688_v18 }
 0x2e7   : > { %3798 = vmatmul.mubr.msk.f32.gmra.mrb[14].mxu1 %vm2131_vm0, %v3794_v32  ;;  %v3120_v32 = vsel %vm6502_vm5, %v4659_v1, %v4664_v27  ;;  %v3824_v27 = vld [vmem:[%s6328_s4 + $0xd8] sm:$0xff] }
 0x2e8   : > { %4072 = vmatpush1.bf16.msk.msra.mxu1 %vm5315_vm15, %v4070_v4  ;;  %2751 = vmatprep.mubr.f32.mxu1 %v4725_v14  ;;  %v3129_v4 = vsel %vm6503_vm9, %v4675_v41, %v4670_v35 }
 0x2e9   : > { %4075 = vmatprep.subr.msk.bf16.mxu1 %vm5026_vm12, %v4073_v17  ;;  %vm6489_vm12 = vmmov %vm6487_vm10 }
 0x2ea   : > { %v2959_v48 = vsel %vm6489_vm12, %v4630_v30, %v4635_v40  ;;  %vm6496_vm10 = vmmov %vm6495_vm2  ;;  %v4683_v30 = vpop.permute.xlu0 %4682  ;;  %v4669_v40 = vunpack.i.l.bf16 %v4668_v25 }
 0x2eb   : > { %3799 = vmatmul.mubr.msk.f32.gmra.mrb[16].mxu1 %vm2131_vm0, %v3795_v19  ;;  %v4082_v10 = vpack.c.bf16 %v2959_v48, %v2958_v49  ;;  %v2968_v61 = vsel %vm6496_vm10, %v4654_v9, %v4649_v47  ;;  %vm6498_vm12 = vmmov %vm6495_vm2  ;;  %v4685_v17 = vunpack.i.h.bf16 %v4683_v30  ;;  %v4684_v13 = vunpack.i.l.bf16 %v4683_v30  ;;  %v3822_v48 = vld [vmem:[%s6328_s4 + $0xc8] sm:$0xff] }
 0x2ec   : > { %4078 = vmatpush1.bf16.msk.msra.mxu1 %vm5315_vm15, %v4076_v43  ;;  %2757 = vmatprep.mubr.f32.mxu1 %v4725_v14  ;;  %v2962_v22 = vsel %vm6498_vm12, %v4649_v47, %v4654_v9  ;;  %v4091_v26 = vpack.c.bf16 %v2969_v3, %v2968_v61  ;;  %v4698_v9 = vpop.permute.xlu1 %4697 }
 0x2ed   : > { %4081 = vmatprep.subr.msk.bf16.mxu1 %vm5400_vm7, %v4079_v33  ;;  %v4094_v37 = vpack.c.bf16 %v2963_v11, %v2962_v22 }
 0x2ee   : > { %v4693_v12 = vpop.permute.xlu0 %4692 }
 0x2ef   : > { %3800 = vmatmul.mubr.msk.f32.gmra.mrb[18].mxu1 %vm2131_vm0, %v3796_v16  ;;  %v4695_v59 = vunpack.i.h.bf16 %v4693_v12  ;;  %v4694_v16 = vunpack.i.l.bf16 %v4693_v12 }
 0x2f0   : > { %2901 = vmatprep.mubr.f32.mxu1 %v4725_v14  ;;  %v4708_v3 = vpop.permute.xlu1 %4707 }
 0x2f1   : > { %v3289_v47 = vsel %vm1797_vm11, %v4695_v59, %v4690_v7  ;;  %v3288_v62 = vsel %vm1797_vm11, %v4694_v16, %v4689_v44  ;;  %v3283_v8 = vsel %vm1797_vm11, %v4690_v7, %v4695_v59  ;;  %v3282_v25 = vsel %vm1797_vm11, %v4689_v44, %v4694_v16 }
 0x2f2   : > { %v4112_v15 = vpack.c.bf16 %v3289_v47, %v3288_v62  ;;  %v4709_v11 = vunpack.i.l.bf16 %v4708_v3  ;;  %v4115_v29 = vpack.c.bf16 %v3283_v8, %v3282_v25 }
 0x2f3   : > { %3817 = vmatmul.mubr.msk.f32.vlgmr.msra.gmra.mrb[12].mxu1 %vm2131_vm0, %v3801_v46  ;;  %v4703_v46 = vpop.permute.xlu0 %4702 }
 0x2f4   : > { %4084 = vmatpush1.bf16.msk.msra.mxu1 %vm5099_vm4, %v4082_v10  ;;  %2907 = vmatprep.mubr.f32.mxu1 %v4725_v14  ;;  %v3823_v10 = vld [vmem:[%s6328_s4 + $0xd0] sm:$0xff]  ;;  %v4705_v1 = vunpack.i.h.bf16 %v4703_v46 }
 0x2f5   : > { %4087 = vmatprep.subr.msk.bf16.mxu1 %vm5400_vm7, %v4085_v60  ;;  %v4700_v60 = vunpack.i.h.bf16 %v4698_v9 }
 0x2f7   : > { %3818 = vmatmul.mubr.msk.f32.gmra.mrb[14].mxu1 %vm2131_vm0, %v3802_v2  ;;  %v4713_v61 = vpop.permute.xlu0 %4712  ;;  %v3291_v0 = vsel %vm1797_vm11, %v4705_v1, %v4700_v60 }
 0x2f8   : > { %4090 = vmatpush1.bf16.msk.msra.mxu1 %vm5099_vm4, %v4088_v21  ;;  %2913 = vmatprep.mubr.f32.mxu1 %v4725_v14  ;;  %v4710_v21 = vunpack.i.h.bf16 %v4708_v3  ;;  %v4715_v22 = vunpack.i.h.bf16 %v4713_v61 }
 0x2f9   : > { %4093 = vmatprep.subr.msk.bf16.mxu1 %vm5400_vm7, %v4091_v26  ;;  %vm6501_vm7 = vmmov %vm6500_vm6  ;;  %v4714_v26 = vunpack.i.l.bf16 %v4713_v61 }
 0x2fa   : > { %v3121_v31 = vsel %vm6501_vm7, %v4660_v23, %v4665_v58  ;;  %v4699_v23 = vunpack.i.l.bf16 %v4698_v9  ;;  %v4704_v58 = vunpack.i.l.bf16 %v4703_v46  ;;  %v3293_v38 = vsel %vm1797_vm11, %v4715_v22, %v4710_v21 }
 0x2fb   : > { %3819 = vmatmul.mubr.msk.f32.gmra.mrb[16].mxu1 %vm2131_vm0, %v3803_v24  ;;  %v4100_v19 = vpack.c.bf16 %v3121_v31, %v3120_v32  ;;  %v3285_v24 = vsel %vm1797_vm11, %v4700_v60, %v4705_v1  ;;  %v3292_v30 = vsel %vm1797_vm11, %v4714_v26, %v4709_v11  ;;  %v3843_v31 = vld [vmem:[%s6328_s4 + $0xf0] sm:$0xff] }
 0x2fc   : > { %4096 = vmatpush1.bf16.msk.msra.mxu1 %vm5099_vm4, %v4094_v37  ;;  %2919 = vmatprep.mubr.f32.mxu1 %v4725_v14  ;;  %vm6504_vm4 = vmmov %vm6502_vm5  ;;  %v3290_v2 = vsel %vm1797_vm11, %v4704_v58, %v4699_v23  ;;  %v3284_v37 = vsel %vm1797_vm11, %v4699_v23, %v4704_v58 }
 0x2fd   : > { %4099 = vmatprep.subr.msk.bf16.mxu1 %vm5533_vm3, %v4097_v51  ;;  %v3128_v39 = vsel %vm6504_vm4, %v4674_v50, %v4669_v40  ;;  %vm6505_vm8 = vmmov %vm6504_vm4  ;;  %v4118_v51 = vpack.c.bf16 %v3291_v0, %v3290_v2 }
 0x2fe   : > { %v3123_v43 = vsel %vm6505_vm8, %v4670_v35, %v4675_v41  ;;  %vm6506_vm2 = vmmov %vm6504_vm4  ;;  %v4102_v52 = vpack.c.bf16 %v3129_v4, %v3128_v39  ;;  %v3842_v35 = vld [vmem:[%s6328_s4 + $0xe8] sm:$0xff]  ;;  %v3287_v41 = vsel %vm1797_vm11, %v4710_v21, %v4715_v22  ;;  %v3857_v4 = vld [vmem:[%s6328_s4 + $0x110] sm:$0xff]  ;;  %v3432_v12 = vpop.permute.xlu0 %3431 }
 0x2ff   : > { %3820 = vmatmul.mubr.msk.f32.gmra.mrb[18].mxu1 %vm2131_vm0, %v3804_v53  ;;  %v3122_v33 = vsel %vm6506_vm2, %v4669_v40, %v4674_v50  ;;  %vm6507_vm10 = vmmov %vm6506_vm2  ;;  %v4121_v40 = vpack.c.bf16 %v3285_v24, %v3284_v37  ;;  %v3286_v50 = vsel %vm1797_vm11, %v4709_v11, %v4714_v26  ;;  %v4124_v53 = vpack.c.bf16 %v3293_v38, %v3292_v30  ;;  %v3858_v39 = vld [vmem:[%s6328_s4 + $0x118] sm:$0xff] }
 0x300   : > { %3063 = vmatprep.mubr.f32.mxu1 %v4725_v14  ;;  %v3131_v34 = vsel %vm6507_vm10, %v4685_v17, %v4680_v5  ;;  %vm6508_vm13 = vmmov %vm6506_vm2  ;;  %v4105_v49 = vpack.c.bf16 %v3123_v43, %v3122_v33  ;;  %v4127_v32 = vpack.c.bf16 %v3287_v41, %v3286_v50 }
 0x301   : > { %v3130_v55 = vsel %vm6508_vm13, %v4684_v13, %v4679_v28  ;;  %vm6509_vm12 = vmmov %vm6506_vm2 }
 0x302   : > { %v3125_v54 = vsel %vm6509_vm12, %v4680_v5, %v4685_v17  ;;  %vm6510_vm14 = vmmov %vm6506_vm2  ;;  %v4107_v56 = vpack.c.bf16 %v3131_v34, %v3130_v55  ;;  %v3427_v5 = vpop.permute.xlu1 %3426 }
 0x303   : > { %3837 = vmatmul.mubr.msk.f32.vlgmr.msra.gmra.mrb[12].mxu1 %vm2131_vm0, %v3821_v42  ;;  %v3124_v57 = vsel %vm6510_vm14, %v4679_v28, %v4684_v13 }
 0x304   : > { %4101 = vmatpush1.bf16.msra.mxu1 %v4100_v19  ;;  %3069 = vmatprep.mubr.f32.mxu1 %v4725_v14  ;;  %v4110_v63 = vpack.c.bf16 %v3125_v54, %v3124_v57  ;;  %v3442_v54 = vpop.permute.xlu0 %3441 }
 0x305   : > { %4104 = vmatprep.subr.msk.bf16.mxu1 %vm5533_vm3, %v4102_v52 }
 0x306   : > { %v3437_v44 = vpop.permute.xlu1 %3436 }
 0x307   : > { %3838 = vmatmul.mubr.msk.f32.gmra.mrb[14].mxu1 %vm2131_vm0, %v3822_v48 }
 0x308   : > { %4106 = vmatpush1.bf16.msra.mxu1 %v4105_v49  ;;  %3075 = vmatprep.mubr.f32.mxu1 %v4725_v14 }
 0x309   : > { %4109 = vmatprep.subr.msk.bf16.mxu1 %vm5533_vm3, %v4107_v56 }
 0x30b   : > { %3839 = vmatmul.mubr.msk.f32.gmra.mrb[16].mxu1 %vm2131_vm0, %v3823_v10 }
 0x30c   : > { %4111 = vmatpush1.bf16.msra.mxu1 %v4110_v63  ;;  %3081 = vmatprep.mubr.f32.mxu1 %v4725_v14 }
 0x30d   : > { %4114 = vmatprep.subr.msk.bf16.mxu1 %vm5627_vm1, %v4112_v15 }
 0x30f   : > { %3840 = vmatmul.mubr.msk.f32.gmra.mrb[18].mxu1 %vm2131_vm0, %v3824_v27 }
 0x310   : > { %3225 = vmatprep.mubr.f32.mxu1 %v4725_v14 }
 0x313   : > { %3851 = vmatmul.mubr.msk.f32.vlgmr.msra.gmra.mrb[12].mxu1 %vm2131_vm0, %v3841_v36 }
 0x314   : > { %4117 = vmatpush1.bf16.msk.msra.mxu1 %vm5315_vm15, %v4115_v29  ;;  %3231 = vmatprep.mubr.f32.mxu1 %v4725_v14 }
 0x315   : > { %4120 = vmatprep.subr.msk.bf16.mxu1 %vm5627_vm1, %v4118_v51 }
 0x317   : > { %3852 = vmatmul.mubr.msk.f32.gmra.mrb[14].mxu1 %vm2131_vm0, %v3842_v35 }
 0x318   : > { %4123 = vmatpush1.bf16.msk.msra.mxu1 %vm5315_vm15, %v4121_v40  ;;  %3237 = vmatprep.mubr.f32.mxu1 %v4725_v14 }
 0x319   : > { %4126 = vmatprep.subr.msk.bf16.mxu1 %vm5627_vm1, %v4124_v53 }
 0x31b   : > { %3853 = vmatmul.mubr.msk.f32.gmra.mrb[16].mxu1 %vm2131_vm0, %v3843_v31 }
 0x31c   : > { %4129 = vmatpush1.bf16.msk.msra.mxu1 %vm5315_vm15, %v4127_v32  ;;  %3243 = vmatprep.mubr.f32.mxu1 %v4725_v14 }
 0x31f   : > { %3854 = vmatmul.mubr.msk.f32.gmra.mrb[18].mxu1 %vm2131_vm0, %v3844_v20 }
 0x320   : > { %3387 = vmatprep.mubr.f32.mxu1 %v4725_v14 }
 0x323   : > { %3871 = vmatmul.mubr.msk.f32.vlgmr.msra.gmra.mrb[12].mxu1 %vm2131_vm0, %v3855_v6 }
 0x324   : > { %3393 = vmatprep.mubr.f32.mxu1 %v4725_v14 }
 0x327   : > { %3872 = vmatmul.mubr.msk.f32.gmra.mrb[14].mxu1 %vm2131_vm0, %v3856_v45 }
 0x328   : > { %3399 = vmatprep.mubr.f32.mxu1 %v4725_v14 }
 0x32b   : > { %3873 = vmatmul.mubr.msk.f32.gmra.mrb[16].mxu1 %vm2131_vm0, %v3857_v4 }
 0x32c   : > { %3405 = vmatprep.mubr.f32.mxu1 %v4725_v14 }
 0x32f   : > { %3874 = vmatmul.mubr.msk.f32.gmra.mrb[18].mxu1 %vm2131_vm0, %v3858_v39 }
 0x3f6   : > { %v3389_v28 = vpop.f32.mrb[12].mxu1 }
 0x3f7   : > { %v3444_v17 = vadd.f32 %v3427_v5, %v3389_v28  ;;  %v3391_v13 = vpop.f32.mrb[13].mxu1 }
 0x3f8   : > { %v3445_v14 = vadd.f32 %v3427_v5, %v3391_v13 }
 0x3f9   : > { %v3452_v18 = vmax.f32 %v3444_v17, 0.0 }
 0x3fa   : > { %v3453_v42 = vmax.f32 %v3445_v14, 0.0  ;;  %v3395_v19 = vpop.f32.mrb[14].mxu1 }
 0x3fb   : > { %3460 = vst [vmem:[%s6311_s16] sm:$0xff] %v3452_v18  ;;  %v3446_v43 = vadd.f32 %v3432_v12, %v3395_v19  ;;  %v3397_v33 = vpop.f32.mrb[15].mxu1 }
 0x3fc   : > { %3461 = vst [vmem:[%s6311_s16 + $0x8] sm:$0xff] %v3453_v42  ;;  %v3447_v52 = vadd.f32 %v3432_v12, %v3397_v33 }
 0x3fd   : > { %v3454_v7 = vmax.f32 %v3446_v43, 0.0 }
 0x3fe   : > { %v3455_v59 = vmax.f32 %v3447_v52, 0.0  ;;  %v3401_v16 = vpop.f32.mrb[16].mxu1 }
 0x3ff   : > { %3462 = vst [vmem:[%s6311_s16 + $0x10] sm:$0xff] %v3454_v7  ;;  %v3448_v34 = vadd.f32 %v3437_v44, %v3401_v16  ;;  %v3403_v55 = vpop.f32.mrb[17].mxu1 }
 0x400   : > { %3463 = vst [vmem:[%s6311_s16 + $0x18] sm:$0xff] %v3455_v59  ;;  %v3449_v48 = vadd.f32 %v3437_v44, %v3403_v55 }
 0x401   : > { %v3456_v49 = vmax.f32 %v3448_v34, 0.0 }
 0x402   : > { %v3457_v57 = vmax.f32 %v3449_v48, 0.0  ;;  %v3407_v56 = vpop.f32.mrb[18].mxu1 }
 0x403   : > { %3464 = vst [vmem:[%s6311_s16 + $0x20] sm:$0xff] %v3456_v49  ;;  %v3450_v47 = vadd.f32 %v3442_v54, %v3407_v56  ;;  %v3409_v62 = vpop.f32.mrb[19].mxu1 }
 0x404   : > { %3465 = vst [vmem:[%s6311_s16 + $0x28] sm:$0xff] %v3457_v57  ;;  %v3451_v9 = vadd.f32 %v3442_v54, %v3409_v62 }
 0x405   : > { %v3458_v46 = vmax.f32 %v3450_v47, 0.0 }
 0x406   : > { %v3459_v10 = vmax.f32 %v3451_v9, 0.0 }
 0x407   : > { %3466 = vst [vmem:[%s6311_s16 + $0x30] sm:$0xff] %v3458_v46 }
 0x408   : > { %3467 = vst [vmem:[%s6311_s16 + $0x38] sm:$0xff] %v3459_v10 }
 0x409 PF: > { %s16_s21 = sadd.s32 1, %s4722_s21  }
 0x40a   : > { %p13_p4 = scmp.ge.s32.totalorder %s16_s21, 4  }
 0x40c   :  { %15 = sbr.rel (!%p13_p4) target bundleno = 1 (0x1), region = 93 }

</bundles_post_ra>
